<compile_context>
chip_gen: v5e
topology: v5e:2x2
jax: 0.10.0
libtpu: 0.0.40
codegen_flags: <defaults>
</compile_context>

<pallas_src>
import numpy as np
import jax
import jax.numpy as jnp
from jax.experimental import pallas as pl
from jax.experimental.pallas import tpu as pltpu

# ---------------- configuration (small, consistent with the module) ----------------
B = 2                      # batch size
FEAT_DIM = 32              # backbone feat_dim (in_channels == out_channels)
H = W = 4                  # spatial size
HEADS = 4                  # gat_heads
GAT_LAYERS = 2             # gat_layers
HIDDEN = FEAT_DIM // HEADS # per-head hidden channels
HF = HEADS * HIDDEN        # concat width (== FEAT_DIM)
EMBED_DIM = 16             # embedding_dim (>0 -> 1x1 conv in the bottleneck)
BN_EPS = 1e-5
NEG_SLOPE = 0.2            # GATv2 leaky-relu slope
N_NODES = 6 * B            # 12 part-nodes, node index n = b*6 + part

# ---- packed-slab row offsets (all 16-aligned so bf16 sublane tiles stay clean) ----
PAIR_ROWS = N_NODES * N_NODES      # 144: pair row index = target*N + source
GS_ROW = PAIR_ROWS                 # 144: adjacency-masked sum selector
HE_ROW = GS_ROW + 16               # 160: head -> channel-block expander
AV_ROW = HE_ROW + 16               # 176: per-image 0/1 part selector
SEL_ROWS = AV_ROW + 16             # 192
SEL_COLS = PAIR_ROWS               # 144

ATT_ROW = FEAT_DIM * GAT_LAYERS          # 64
WNECK_ROW = ATT_ROW + HF * GAT_LAYERS    # 128
WTS_ROWS = WNECK_ROW + FEAT_DIM          # 160
WTS_COLS = 128

_VMEM = pl.BlockSpec(memory_space=pltpu.MemorySpace.VMEM)


# ---------------- fused Pallas kernel ----------------
def _fused_head_kernel(x_ref, poolk_ref, sel_ref, wts_ref, fb_ref, out_ref):
    f32, bf16 = jnp.float32, jnp.bfloat16
    n = N_NODES

    # constant selectors / broadcasters (values 0/1 or 1/16 -> exact in bf16)
    rt = sel_ref[0:PAIR_ROWS, 0:n]                 # [N*N, N] pick target node of pair (t, j)
    rs = sel_ref[0:PAIR_ROWS, n:2 * n]             # [N*N, N] pick source node of pair (t, j)
    gsum = sel_ref[GS_ROW:GS_ROW + n, 0:PAIR_ROWS]  # [N, N*N] adjacency-MASKED sum over sources
    hexp = sel_ref[HE_ROW:HE_ROW + HEADS, 0:HF]     # [heads, HF] per-head scalar -> channel block
    avg = sel_ref[AV_ROW:AV_ROW + B, 0:n]           # [B, N] 0/1 part selector (1/6 applied in f32)

    # 1) global average pooling: one bf16 MXU pass, channels land on lanes.
    #    x_ref is the contiguous [N, D*HW] view (node n = b*6 + part, col = c*HW + hw).
    pooled = jnp.dot(x_ref[...].astype(bf16), poolk_ref[...],
                     preferred_element_type=f32)                                # [N, D]

    def gatv2(x, wlr, att_bd, b_lr, bias):
        # fused lin_l | lin_r (bf16 x bf16 operands, f32 accumulation)
        xlr = jnp.dot(x.astype(bf16), wlr, preferred_element_type=f32) + b_lr   # [N, 2*HF]
        xl = xlr[:, :HF].astype(bf16)            # lin_l(x): source / value term
        xr = xlr[:, HF:].astype(bf16)            # lin_r(x): target term
        # pairwise (target + source) sums for all heads at once, via 0/1 selectors
        xl_src = jnp.dot(rs, xl, preferred_element_type=f32)                    # [N*N, HF] = xl[j]
        xr_tgt = jnp.dot(rt, xr, preferred_element_type=f32)                    # [N*N, HF] = xr[t]
        s = xr_tgt + xl_src
        s = jnp.where(s > 0, s, NEG_SLOPE * s)                                  # LeakyReLU(0.2), f32
        # attention logits; adjacency is NOT applied here (it is folded into `gsum`)
        logits = jnp.dot(s.astype(bf16), att_bd, preferred_element_type=f32)    # [N*N, heads]
        # No softmax max-shift: logits are O(1) for this workload (far from the f32
        # exp range) and den >= exp(self-loop logit) > 0.
        # TODO(synk): per-target max shift for robustness with trained weights.
        p = jnp.exp(logits)                                                     # f32
        # divide-after-aggregation (masked softmax); mask lives inside `gsum`.
        p_c = jnp.dot(p.astype(bf16), hexp, preferred_element_type=f32)         # [N*N, HF]
        num = jnp.dot(gsum, (p_c * xl_src).astype(bf16),
                      preferred_element_type=f32)                               # [N, HF]
        den = jnp.dot(gsum, p_c.astype(bf16), preferred_element_type=f32)       # [N, HF]
        return num / den + bias

    x = pooled
    for li in range(GAT_LAYERS):
        wlr = wts_ref[FEAT_DIM * li:FEAT_DIM * (li + 1), 0:2 * HF]
        att = wts_ref[ATT_ROW + HF * li:ATT_ROW + HF * (li + 1), 0:HEADS]
        b_lr = fb_ref[li:li + 1, 0:2 * HF]
        bias = fb_ref[GAT_LAYERS + li:GAT_LAYERS + li + 1, 0:HF]
        x = gatv2(x, wlr, att, b_lr, bias)                  # F.dropout: eval-mode identity
        if li + 1 < GAT_LAYERS:
            x = jnp.where(x > 0, x, jnp.exp(x) - 1.0)       # ELU between GAT layers

    graph = x + pooled                                      # residual (head glue)
    # mean over the 6 parts of each image: 0/1 bf16 selector matmul, exact 1/6 post-scale in f32
    avg_x = jnp.dot(avg, graph.astype(bf16), preferred_element_type=f32) * (1.0 / 6.0)   # [B, D]
    # bottleneck: 1x1 conv with eval BatchNorm folded into the bf16 weight
    w_neck = wts_ref[WNECK_ROW:WNECK_ROW + FEAT_DIM, 0:EMBED_DIM]
    shift = fb_ref[2 * GAT_LAYERS:2 * GAT_LAYERS + 1, 0:EMBED_DIM]
    y = jnp.dot(avg_x.astype(bf16), w_neck, preferred_element_type=f32) + shift          # [B, E]
    out_ref[...] = y   # single tiny store; every intermediate stayed on-chip


# ---------------- host-side constants (hoisted out of the forward path) ----------------
def build_intra_adj(batchsize, img_num_ps):
    """Dense intra-graph adjacency (node index n = b*6 + part), self-loops on."""
    n = 6 * batchsize
    keep = np.ones((n,), np.float32)
    for b, vis in enumerate(img_num_ps):
        keep[6 * b + vis: 6 * (b + 1)] = 0.0                  # mask missing parts
    same_img = np.kron(np.eye(batchsize, dtype=np.float32), np.ones((6, 6), np.float32))
    mask = (same_img * keep[:, None] * keep[None, :] > 0).astype(np.float32)
    np.fill_diagonal(mask, 1.0)                               # GATv2Conv(add_self_loops=True)
    return mask


def build_packed(params, batchsize, img_num_ps):
    """Pack all selectors + weights into 3 lane-dense slabs (built once with numpy)."""
    n = 6 * batchsize
    hw = H * W
    mask = build_intra_adj(batchsize, img_num_ps)
    eye_n = np.eye(n, dtype=np.float32)

    sel = np.zeros((SEL_ROWS, SEL_COLS), np.float32)
    sel[0:PAIR_ROWS, 0:n] = np.kron(eye_n, np.ones((n, 1), np.float32))          # rt
    sel[0:PAIR_ROWS, n:2 * n] = np.kron(np.ones((n, 1), np.float32), eye_n)      # rs
    # adjacency-masked segment-sum selector: gsum[t, t*N + j] = mask[t, j]
    sel[GS_ROW:GS_ROW + n, 0:n * n] = (eye_n[:, :, None] * mask[:, None, :]).reshape(n, n * n)
    sel[HE_ROW:HE_ROW + HEADS, 0:HF] = np.kron(np.eye(HEADS, dtype=np.float32),
                                               np.ones((1, HIDDEN), np.float32))
    sel[AV_ROW:AV_ROW + batchsize, 0:n] = np.kron(np.eye(batchsize, dtype=np.float32),
                                                  np.ones((1, 6), np.float32))

    # pooling selector: pool_k[c*HW + hw, c] = 1/HW  (1/16 is exact in bf16)
    pool_k = np.kron(np.eye(FEAT_DIM, dtype=np.float32),
                     np.ones((hw, 1), np.float32)) / hw                           # [D*HW, D]

    wts = np.zeros((WTS_ROWS, WTS_COLS), np.float32)
    for li, lp in enumerate(params["gat"]):
        wts[FEAT_DIM * li:FEAT_DIM * (li + 1), 0:2 * HF] = np.asarray(lp["w_lr"])
        wts[ATT_ROW + HF * li:ATT_ROW + HF * (li + 1), 0:HEADS] = np.asarray(lp["att_bd"])
    wts[WNECK_ROW:WNECK_ROW + FEAT_DIM, 0:EMBED_DIM] = np.asarray(params["neck"]["w"])

    fb = np.zeros((8, 128), np.float32)
    for li, lp in enumerate(params["gat"]):
        fb[li, 0:2 * HF] = np.asarray(lp["b_lr"])[0]
        fb[GAT_LAYERS + li, 0:HF] = np.asarray(lp["bias"])[0]
    fb[2 * GAT_LAYERS, 0:EMBED_DIM] = np.asarray(params["neck"]["shift"])[0]

    return {
        "pool_k": jnp.asarray(pool_k, jnp.bfloat16),   # exact
        "sel": jnp.asarray(sel, jnp.bfloat16),         # exact (0/1)
        "wts": jnp.asarray(wts, jnp.bfloat16),         # weights already bf16-valued
        "fb": jnp.asarray(fb, jnp.float32),
    }


# ---------------- parameters ----------------
def init_params(key):
    lim = float(1.0 / np.sqrt(FEAT_DIM))

    def bf16_vals(a):   # round once onto the bf16 grid, keep an f32 container
        return jnp.asarray(a, jnp.bfloat16).astype(jnp.float32)

    gat = []
    for _ in range(GAT_LAYERS):
        key, k0, k1, k2 = jax.random.split(key, 4)
        wl = jax.random.uniform(k0, (FEAT_DIM, HF), jnp.float32, -lim, lim)     # lin_l.weight^T
        wr = jax.random.uniform(k1, (FEAT_DIM, HF), jnp.float32, -lim, lim)     # lin_r.weight^T
        att = jax.random.uniform(k2, (HEADS, HIDDEN), jnp.float32, -lim, lim)   # att vector
        # block-diagonal att so every head's logits come out of one MXU matmul
        att_bd = (jnp.eye(HEADS, dtype=jnp.float32)[:, None, :] * att[:, :, None]).reshape(HF, HEADS)
        gat.append({
            "w_lr": bf16_vals(jnp.concatenate([wl, wr], axis=1)),   # [D, 2*HF]
            "b_lr": jnp.zeros((1, 2 * HF), jnp.float32),
            "att_bd": bf16_vals(att_bd),                            # [HF, heads]
            "bias": jnp.zeros((1, HF), jnp.float32),
        })
    key, kc = jax.random.split(key)
    conv_w = jax.random.normal(kc, (EMBED_DIM, FEAT_DIM), jnp.float32) * 0.05   # Conv2d(D,E,1,bias=False)
    gamma = jnp.ones((EMBED_DIM,), jnp.float32)
    beta = jnp.zeros((EMBED_DIM,), jnp.float32)
    running_mean = jnp.zeros((EMBED_DIM,), jnp.float32)
    running_var = jnp.ones((EMBED_DIM,), jnp.float32)
    scale = gamma / jnp.sqrt(running_var + BN_EPS)
    shift = beta - running_mean * scale
    neck = {"w": bf16_vals(conv_w.T * scale[None, :]),              # BN folded into the conv
            "shift": shift.reshape(1, -1).astype(jnp.float32)}
    return {"gat": gat, "neck": neck}


# ---------------- jitted forward: zero wrapper compute + one pallas_call ----------------
@jax.jit
def embedding_gat_head_forward(features, packed):
    b = features.shape[0]
    n = 6 * b
    # node n = b*6 + part, column = c*HW + hw: a pure contiguous reshape (no copy/transpose)
    feats = features.reshape(n, FEAT_DIM * H * W)
    return pl.pallas_call(
        _fused_head_kernel,
        out_shape=jax.ShapeDtypeStruct((b, EMBED_DIM), jnp.float32),
        in_specs=[_VMEM] * 5,
        out_specs=_VMEM,
        # Gridless single block: total VMEM footprint < 0.5 MiB.
    )(feats, packed["pool_k"], packed["sel"], packed["wts"], packed["fb"])


# ---------------- pure-JAX reference (per-head GATv2, module semantics) ----------------
def reference_forward(features, params, img_num_ps):
    f32, bf16 = jnp.float32, jnp.bfloat16
    b = features.shape[0]
    n = 6 * b
    mask = jnp.asarray(build_intra_adj(b, img_num_ps))                       # [n, n] 0/1
    feats = features.reshape(n, FEAT_DIM, H * W).astype(bf16).astype(f32)
    pooled = feats.sum(axis=-1) * (1.0 / (H * W))                            # [n, D]
    x = pooled
    for li, lp in enumerate(params["gat"]):
        xlr = jnp.dot(x.astype(bf16), lp["w_lr"].astype(bf16),
                      preferred_element_type=f32) + lp["b_lr"]
        xl = xlr[:, :HF].astype(bf16).astype(f32)
        xr = xlr[:, HF:].astype(bf16).astype(f32)
        outs = []
        for h in range(HEADS):
            sl = slice(h * HIDDEN, (h + 1) * HIDDEN)
            a_h = lp["att_bd"][sl, h]                                        # bf16-valued f32
            s = xr[:, None, sl] + xl[None, :, sl]                            # [n, n, HIDDEN]
            s = jnp.where(s > 0, s, NEG_SLOPE * s)
            e = jnp.sum(s.astype(bf16).astype(f32) * a_h[None, None, :], axis=-1)   # [n, n]
            p = jnp.exp(e).astype(bf16).astype(f32)
            w = (p[:, :, None] * xl[None, :, sl]).astype(bf16).astype(f32)   # [n, n, HIDDEN]
            num = jnp.sum(mask[:, :, None] * w, axis=1)                      # [n, HIDDEN]
            den = jnp.sum(mask * p, axis=1, keepdims=True)                   # [n, 1]
            outs.append(num / den)
        x = jnp.concatenate(outs, axis=-1) + lp["bias"]
        if li + 1 < len(params["gat"]):
            x = jnp.where(x > 0, x, jnp.exp(x) - 1.0)                        # ELU
    graph = (x + pooled).astype(bf16).astype(f32)
    avg = graph.reshape(b, 6, FEAT_DIM).sum(axis=1) * (1.0 / 6.0)
    return jnp.dot(avg.astype(bf16), params["neck"]["w"].astype(bf16),
                   preferred_element_type=f32) + params["neck"]["shift"]


if __name__ == "__main__":
    key = jax.random.PRNGKey(0)
    kf, kp = jax.random.split(key)
    features = jax.random.normal(kf, (B, 6 * FEAT_DIM, H, W), jnp.float32)   # NCHW
    params = init_params(kp)
    img_num_ps = [6, 4]   # per-image visible part counts (second image has 2 masked parts)

    packed = build_packed(params, B, img_num_ps)   # built once, reused every forward

    out = jax.block_until_ready(embedding_gat_head_forward(features, packed))
    assert out.shape == (B, EMBED_DIM)
    assert bool(jnp.all(jnp.isfinite(out)))

    # correctness check against a pure-JAX reference of the same eval forward
    ref = jax.block_until_ready(reference_forward(features, params, img_num_ps))
    np.testing.assert_allclose(np.asarray(out), np.asarray(ref), rtol=1e-2, atol=1e-3)

    print("KERNEL_OK")
</pallas_src>

<mosaic_0001>
module attributes {stable_mosaic.version = 11 : i64} {
  func.func @_fused_head_kernel(%arg0: memref<12x512xf32, #tpu.memory_space<vmem>>, %arg1: memref<512x32xbf16, #tpu.memory_space<vmem>>, %arg2: memref<192x144xbf16, #tpu.memory_space<vmem>>, %arg3: memref<160x128xbf16, #tpu.memory_space<vmem>>, %arg4: memref<8x128xf32, #tpu.memory_space<vmem>>, %arg5: memref<2x16xf32, #tpu.memory_space<vmem>>) attributes {dimension_semantics = [], scalar_prefetch = 0 : i64, scratch_operands = 0 : i64, tpu.core_type = #tpu.core_type<tc>} {
    %c0 = arith.constant 0 : index
    %c0_0 = arith.constant 0 : index
    %0 = vector.load %arg2[%c0, %c0_0] : memref<192x144xbf16, #tpu.memory_space<vmem>>, vector<144x12xbf16>
    %c0_1 = arith.constant 0 : index
    %c12 = arith.constant 12 : index
    %1 = vector.load %arg2[%c0_1, %c12] : memref<192x144xbf16, #tpu.memory_space<vmem>>, vector<144x12xbf16>
    %c144 = arith.constant 144 : index
    %c0_2 = arith.constant 0 : index
    %2 = vector.load %arg2[%c144, %c0_2] : memref<192x144xbf16, #tpu.memory_space<vmem>>, vector<12x144xbf16>
    %c160 = arith.constant 160 : index
    %c0_3 = arith.constant 0 : index
    %3 = vector.load %arg2[%c160, %c0_3] : memref<192x144xbf16, #tpu.memory_space<vmem>>, vector<4x32xbf16>
    %c176 = arith.constant 176 : index
    %c0_4 = arith.constant 0 : index
    %4 = vector.load %arg2[%c176, %c0_4] : memref<192x144xbf16, #tpu.memory_space<vmem>>, vector<2x12xbf16>
    %c0_5 = arith.constant 0 : index
    %c0_6 = arith.constant 0 : index
    %5 = vector.load %arg0[%c0_5, %c0_6] : memref<12x512xf32, #tpu.memory_space<vmem>>, vector<12x512xf32>
    %6 = arith.truncf %5 : vector<12x512xf32> to vector<12x512xbf16>
    %c0_7 = arith.constant 0 : index
    %c0_8 = arith.constant 0 : index
    %7 = vector.load %arg1[%c0_7, %c0_8] : memref<512x32xbf16, #tpu.memory_space<vmem>>, vector<512x32xbf16>
    %cst = arith.constant dense<0.000000e+00> : vector<12x32xf32>
    %8 = tpu.matmul %6, %7, %cst {dimension_numbers = #tpu.dot_dimension_numbers<[1], [0], [0], [1], [0, 0, 1, 1], [], []>} : vector<12x512xbf16>, vector<512x32xbf16>, vector<12x32xf32> -> vector<12x32xf32>
    %c0_9 = arith.constant 0 : index
    %c0_10 = arith.constant 0 : index
    %9 = vector.load %arg3[%c0_9, %c0_10] : memref<160x128xbf16, #tpu.memory_space<vmem>>, vector<32x64xbf16>
    %c64 = arith.constant 64 : index
    %c0_11 = arith.constant 0 : index
    %10 = vector.load %arg3[%c64, %c0_11] : memref<160x128xbf16, #tpu.memory_space<vmem>>, vector<32x4xbf16>
    %c0_12 = arith.constant 0 : index
    %c0_13 = arith.constant 0 : index
    %11 = vector.load %arg4[%c0_12, %c0_13] : memref<8x128xf32, #tpu.memory_space<vmem>>, vector<1x64xf32>
    %c2 = arith.constant 2 : index
    %c0_14 = arith.constant 0 : index
    %12 = vector.load %arg4[%c2, %c0_14] : memref<8x128xf32, #tpu.memory_space<vmem>>, vector<1x32xf32>
    %13 = arith.truncf %8 : vector<12x32xf32> to vector<12x32xbf16>
    %cst_15 = arith.constant dense<0.000000e+00> : vector<12x64xf32>
    %14 = tpu.matmul %13, %9, %cst_15 {dimension_numbers = #tpu.dot_dimension_numbers<[1], [0], [0], [1], [0, 0, 1, 1], [], []>} : vector<12x32xbf16>, vector<32x64xbf16>, vector<12x64xf32> -> vector<12x64xf32>
    %15 = vector.broadcast %11 : vector<1x64xf32> to vector<12x64xf32>
    %16 = arith.addf %14, %15 : vector<12x64xf32>
    %17 = vector.extract_strided_slice %16 {offsets = [0, 0], sizes = [12, 32], strides = [1, 1]} : vector<12x64xf32> to vector<12x32xf32>
    %18 = arith.truncf %17 : vector<12x32xf32> to vector<12x32xbf16>
    %19 = vector.extract_strided_slice %16 {offsets = [0, 32], sizes = [12, 32], strides = [1, 1]} : vector<12x64xf32> to vector<12x32xf32>
    %20 = arith.truncf %19 : vector<12x32xf32> to vector<12x32xbf16>
    %cst_16 = arith.constant dense<0.000000e+00> : vector<144x32xf32>
    %21 = tpu.matmul %1, %18, %cst_16 {dimension_numbers = #tpu.dot_dimension_numbers<[1], [0], [0], [1], [0, 0, 1, 1], [], []>} : vector<144x12xbf16>, vector<12x32xbf16>, vector<144x32xf32> -> vector<144x32xf32>
    %cst_17 = arith.constant dense<0.000000e+00> : vector<144x32xf32>
    %22 = tpu.matmul %0, %20, %cst_17 {dimension_numbers = #tpu.dot_dimension_numbers<[1], [0], [0], [1], [0, 0, 1, 1], [], []>} : vector<144x12xbf16>, vector<12x32xbf16>, vector<144x32xf32> -> vector<144x32xf32>
    %23 = arith.addf %22, %21 : vector<144x32xf32>
    %cst_18 = arith.constant 0.000000e+00 : f32
    %24 = vector.broadcast %cst_18 : f32 to vector<144x32xf32>
    %25 = arith.cmpf ogt, %23, %24 : vector<144x32xf32>
    %cst_19 = arith.constant 2.000000e-01 : f32
    %26 = vector.broadcast %cst_19 : f32 to vector<144x32xf32>
    %27 = arith.mulf %26, %23 : vector<144x32xf32>
    %28 = arith.select %25, %23, %27 : vector<144x32xi1>, vector<144x32xf32>
    %29 = arith.truncf %28 : vector<144x32xf32> to vector<144x32xbf16>
    %cst_20 = arith.constant dense<0.000000e+00> : vector<144x4xf32>
    %30 = tpu.matmul %29, %10, %cst_20 {dimension_numbers = #tpu.dot_dimension_numbers<[1], [0], [0], [1], [0, 0, 1, 1], [], []>} : vector<144x32xbf16>, vector<32x4xbf16>, vector<144x4xf32> -> vector<144x4xf32>
    %31 = math.exp %30 : vector<144x4xf32>
    %32 = arith.truncf %31 : vector<144x4xf32> to vector<144x4xbf16>
    %cst_21 = arith.constant dense<0.000000e+00> : vector<144x32xf32>
    %33 = tpu.matmul %32, %3, %cst_21 {dimension_numbers = #tpu.dot_dimension_numbers<[1], [0], [0], [1], [0, 0, 1, 1], [], []>} : vector<144x4xbf16>, vector<4x32xbf16>, vector<144x32xf32> -> vector<144x32xf32>
    %34 = arith.mulf %33, %21 : vector<144x32xf32>
    %35 = arith.truncf %34 : vector<144x32xf32> to vector<144x32xbf16>
    %cst_22 = arith.constant dense<0.000000e+00> : vector<12x32xf32>
    %36 = tpu.matmul %2, %35, %cst_22 {dimension_numbers = #tpu.dot_dimension_numbers<[1], [0], [0], [1], [0, 0, 1, 1], [], []>} : vector<12x144xbf16>, vector<144x32xbf16>, vector<12x32xf32> -> vector<12x32xf32>
    %37 = arith.truncf %33 : vector<144x32xf32> to vector<144x32xbf16>
    %cst_23 = arith.constant dense<0.000000e+00> : vector<12x32xf32>
    %38 = tpu.matmul %2, %37, %cst_23 {dimension_numbers = #tpu.dot_dimension_numbers<[1], [0], [0], [1], [0, 0, 1, 1], [], []>} : vector<12x144xbf16>, vector<144x32xbf16>, vector<12x32xf32> -> vector<12x32xf32>
    %39 = arith.divf %36, %38 : vector<12x32xf32>
    %40 = vector.broadcast %12 : vector<1x32xf32> to vector<12x32xf32>
    %41 = arith.addf %39, %40 : vector<12x32xf32>
    %cst_24 = arith.constant 0.000000e+00 : f32
    %42 = vector.broadcast %cst_24 : f32 to vector<12x32xf32>
    %43 = arith.cmpf ogt, %41, %42 : vector<12x32xf32>
    %44 = math.exp %41 : vector<12x32xf32>
    %cst_25 = arith.constant 1.000000e+00 : f32
    %45 = vector.broadcast %cst_25 : f32 to vector<12x32xf32>
    %46 = arith.subf %44, %45 : vector<12x32xf32>
    %47 = arith.select %43, %41, %46 : vector<12x32xi1>, vector<12x32xf32>
    %c32 = arith.constant 32 : index
    %c0_26 = arith.constant 0 : index
    %48 = vector.load %arg3[%c32, %c0_26] : memref<160x128xbf16, #tpu.memory_space<vmem>>, vector<32x64xbf16>
    %c96 = arith.constant 96 : index
    %c0_27 = arith.constant 0 : index
    %49 = vector.load %arg3[%c96, %c0_27] : memref<160x128xbf16, #tpu.memory_space<vmem>>, vector<32x4xbf16>
    %c1 = arith.constant 1 : index
    %c0_28 = arith.constant 0 : index
    %50 = vector.load %arg4[%c1, %c0_28] : memref<8x128xf32, #tpu.memory_space<vmem>>, vector<1x64xf32>
    %c3 = arith.constant 3 : index
    %c0_29 = arith.constant 0 : index
    %51 = vector.load %arg4[%c3, %c0_29] : memref<8x128xf32, #tpu.memory_space<vmem>>, vector<1x32xf32>
    %52 = arith.truncf %47 : vector<12x32xf32> to vector<12x32xbf16>
    %cst_30 = arith.constant dense<0.000000e+00> : vector<12x64xf32>
    %53 = tpu.matmul %52, %48, %cst_30 {dimension_numbers = #tpu.dot_dimension_numbers<[1], [0], [0], [1], [0, 0, 1, 1], [], []>} : vector<12x32xbf16>, vector<32x64xbf16>, vector<12x64xf32> -> vector<12x64xf32>
    %54 = vector.broadcast %50 : vector<1x64xf32> to vector<12x64xf32>
    %55 = arith.addf %53, %54 : vector<12x64xf32>
    %56 = vector.extract_strided_slice %55 {offsets = [0, 0], sizes = [12, 32], strides = [1, 1]} : vector<12x64xf32> to vector<12x32xf32>
    %57 = arith.truncf %56 : vector<12x32xf32> to vector<12x32xbf16>
    %58 = vector.extract_strided_slice %55 {offsets = [0, 32], sizes = [12, 32], strides = [1, 1]} : vector<12x64xf32> to vector<12x32xf32>
    %59 = arith.truncf %58 : vector<12x32xf32> to vector<12x32xbf16>
    %cst_31 = arith.constant dense<0.000000e+00> : vector<144x32xf32>
    %60 = tpu.matmul %1, %57, %cst_31 {dimension_numbers = #tpu.dot_dimension_numbers<[1], [0], [0], [1], [0, 0, 1, 1], [], []>} : vector<144x12xbf16>, vector<12x32xbf16>, vector<144x32xf32> -> vector<144x32xf32>
    %cst_32 = arith.constant dense<0.000000e+00> : vector<144x32xf32>
    %61 = tpu.matmul %0, %59, %cst_32 {dimension_numbers = #tpu.dot_dimension_numbers<[1], [0], [0], [1], [0, 0, 1, 1], [], []>} : vector<144x12xbf16>, vector<12x32xbf16>, vector<144x32xf32> -> vector<144x32xf32>
    %62 = arith.addf %61, %60 : vector<144x32xf32>
    %cst_33 = arith.constant 0.000000e+00 : f32
    %63 = vector.broadcast %cst_33 : f32 to vector<144x32xf32>
    %64 = arith.cmpf ogt, %62, %63 : vector<144x32xf32>
    %cst_34 = arith.constant 2.000000e-01 : f32
    %65 = vector.broadcast %cst_34 : f32 to vector<144x32xf32>
    %66 = arith.mulf %65, %62 : vector<144x32xf32>
    %67 = arith.select %64, %62, %66 : vector<144x32xi1>, vector<144x32xf32>
    %68 = arith.truncf %67 : vector<144x32xf32> to vector<144x32xbf16>
    %cst_35 = arith.constant dense<0.000000e+00> : vector<144x4xf32>
    %69 = tpu.matmul %68, %49, %cst_35 {dimension_numbers = #tpu.dot_dimension_numbers<[1], [0], [0], [1], [0, 0, 1, 1], [], []>} : vector<144x32xbf16>, vector<32x4xbf16>, vector<144x4xf32> -> vector<144x4xf32>
    %70 = math.exp %69 : vector<144x4xf32>
    %71 = arith.truncf %70 : vector<144x4xf32> to vector<144x4xbf16>
    %cst_36 = arith.constant dense<0.000000e+00> : vector<144x32xf32>
    %72 = tpu.matmul %71, %3, %cst_36 {dimension_numbers = #tpu.dot_dimension_numbers<[1], [0], [0], [1], [0, 0, 1, 1], [], []>} : vector<144x4xbf16>, vector<4x32xbf16>, vector<144x32xf32> -> vector<144x32xf32>
    %73 = arith.mulf %72, %60 : vector<144x32xf32>
    %74 = arith.truncf %73 : vector<144x32xf32> to vector<144x32xbf16>
    %cst_37 = arith.constant dense<0.000000e+00> : vector<12x32xf32>
    %75 = tpu.matmul %2, %74, %cst_37 {dimension_numbers = #tpu.dot_dimension_numbers<[1], [0], [0], [1], [0, 0, 1, 1], [], []>} : vector<12x144xbf16>, vector<144x32xbf16>, vector<12x32xf32> -> vector<12x32xf32>
    %76 = arith.truncf %72 : vector<144x32xf32> to vector<144x32xbf16>
    %cst_38 = arith.constant dense<0.000000e+00> : vector<12x32xf32>
    %77 = tpu.matmul %2, %76, %cst_38 {dimension_numbers = #tpu.dot_dimension_numbers<[1], [0], [0], [1], [0, 0, 1, 1], [], []>} : vector<12x144xbf16>, vector<144x32xbf16>, vector<12x32xf32> -> vector<12x32xf32>
    %78 = arith.divf %75, %77 : vector<12x32xf32>
    %79 = vector.broadcast %51 : vector<1x32xf32> to vector<12x32xf32>
    %80 = arith.addf %78, %79 : vector<12x32xf32>
    %81 = arith.addf %80, %8 : vector<12x32xf32>
    %82 = arith.truncf %81 : vector<12x32xf32> to vector<12x32xbf16>
    %cst_39 = arith.constant dense<0.000000e+00> : vector<2x32xf32>
    %83 = tpu.matmul %4, %82, %cst_39 {dimension_numbers = #tpu.dot_dimension_numbers<[1], [0], [0], [1], [0, 0, 1, 1], [], []>} : vector<2x12xbf16>, vector<12x32xbf16>, vector<2x32xf32> -> vector<2x32xf32>
    %cst_40 = arith.constant 0.166666672 : f32
    %84 = vector.broadcast %cst_40 : f32 to vector<2x32xf32>
    %85 = arith.mulf %83, %84 : vector<2x32xf32>
    %c128 = arith.constant 128 : index
    %c0_41 = arith.constant 0 : index
    %86 = vector.load %arg3[%c128, %c0_41] : memref<160x128xbf16, #tpu.memory_space<vmem>>, vector<32x16xbf16>
    %c4 = arith.constant 4 : index
    %c0_42 = arith.constant 0 : index
    %87 = vector.load %arg4[%c4, %c0_42] : memref<8x128xf32, #tpu.memory_space<vmem>>, vector<1x16xf32>
    %88 = arith.truncf %85 : vector<2x32xf32> to vector<2x32xbf16>
    %cst_43 = arith.constant dense<0.000000e+00> : vector<2x16xf32>
    %89 = tpu.matmul %88, %86, %cst_43 {dimension_numbers = #tpu.dot_dimension_numbers<[1], [0], [0], [1], [0, 0, 1, 1], [], []>} : vector<2x32xbf16>, vector<32x16xbf16>, vector<2x16xf32> -> vector<2x16xf32>
    %90 = vector.broadcast %87 : vector<1x16xf32> to vector<2x16xf32>
    %91 = arith.addf %89, %90 : vector<2x16xf32>
    %c0_44 = arith.constant 0 : index
    %c0_45 = arith.constant 0 : index
    %92 = vector.load %arg5[%c0_44, %c0_45] : memref<2x16xf32, #tpu.memory_space<vmem>>, vector<2x16xf32>
    tpu.vector_store %arg5[%c0_44, %c0_45], %91 {strides = array<i32>} : memref<2x16xf32, #tpu.memory_space<vmem>>, vector<2x16xf32>,
    return
  }
}

</mosaic_0001>

<bundles_post_ra>
// kernel: embedding_gat_head_forward.1
= control target key start
LH: loop header
LB: loop body
LE: loop exit
PB: predicated region body
PF: predicated region fallthrough
CT: control target
= control target key end

     0   :  { %s2854_s0 = inlined_call_operand.vmem [shape: f32[12,512], index: 0, kind: input, shape index: {}]   ;;  %s2855_s1 = inlined_call_operand.vmem [shape: bf16[512,32], index: 1, kind: input, shape index: {}]   ;;  %s2856_s2 = inlined_call_operand.vmem [shape: bf16[192,144], index: 2, kind: input, shape index: {}]   ;;  %s2857_s3 = inlined_call_operand.vmem [shape: bf16[160,128], index: 3, kind: input, shape index: {}]   ;;  %s2858_s4 = inlined_call_operand.vmem [shape: f32[8,128], index: 4, kind: input, shape index: {}]   ;;  %s2859_s5 = inlined_call_operand.hbm [shape: f32[2,16], index: 5, kind: output, shape index: {}]  }
   0x1   :  { %v2036_v0 = vld [vmem:[%s2855_s1 + $0x38] sm:$0xff]  ;;  %v2035_v4 = vld [vmem:[%s2855_s1 + $0x30] sm:$0xff]  ;;  %v2034_v8 = vld [vmem:[%s2855_s1 + $0x28] sm:$0xff] }
   0x2   :  { %v2044_v1 = vld [vmem:[%s2855_s1 + $0x78] sm:$0xff]  ;;  %312 = vmatpush.bf16.msra.mxu0 %v2036_v0  ;;  %v2043_v5 = vld [vmem:[%s2855_s1 + $0x70] sm:$0xff]  ;;  %v2042_v9 = vld [vmem:[%s2855_s1 + $0x68] sm:$0xff] }
   0x3   :  { %v2052_v2 = vld [vmem:[%s2855_s1 + $0xb8] sm:$0xff]  ;;  %326 = vmatpush.bf16.msra.mxu1 %v2044_v1  ;;  %v2051_v6 = vld [vmem:[%s2855_s1 + $0xb0] sm:$0xff]  ;;  %v2050_v10 = vld [vmem:[%s2855_s1 + $0xa8] sm:$0xff] }
   0x4   :  { %v2060_v3 = vld [vmem:[%s2855_s1 + $0xf8] sm:$0xff]  ;;  %340 = vmatpush.bf16.msra.mxu2 %v2052_v2  ;;  %v2059_v7 = vld [vmem:[%s2855_s1 + $0xf0] sm:$0xff]  ;;  %v2058_v11 = vld [vmem:[%s2855_s1 + $0xe8] sm:$0xff] }
   0x5   :  { %354 = vmatpush.bf16.msra.mxu3 %v2060_v3  ;;  %v2033_v12 = vld [vmem:[%s2855_s1 + $0x20] sm:$0xff]  ;;  %v2032_v16 = vld [vmem:[%s2855_s1 + $0x18] sm:$0xff] }
   0x6   :  { %313 = vmatpush.bf16.msra.mxu0 %v2035_v4  ;;  %v2041_v13 = vld [vmem:[%s2855_s1 + $0x60] sm:$0xff]  ;;  %v2040_v17 = vld [vmem:[%s2855_s1 + $0x58] sm:$0xff] }
   0x7   :  { %327 = vmatpush.bf16.msra.mxu1 %v2043_v5  ;;  %v2049_v14 = vld [vmem:[%s2855_s1 + $0xa0] sm:$0xff]  ;;  %v2048_v18 = vld [vmem:[%s2855_s1 + $0x98] sm:$0xff] }
   0x8   :  { %341 = vmatpush.bf16.msra.mxu2 %v2051_v6  ;;  %v2057_v15 = vld [vmem:[%s2855_s1 + $0xe0] sm:$0xff]  ;;  %v2056_v19 = vld [vmem:[%s2855_s1 + $0xd8] sm:$0xff] }
   0x9   :  { %355 = vmatpush.bf16.msra.mxu3 %v2059_v7 }
   0xa   :  { %314 = vmatpush.bf16.msra.mxu0 %v2034_v8 }
   0xb   :  { %328 = vmatpush.bf16.msra.mxu1 %v2042_v9 }
   0xc   :  { %342 = vmatpush.bf16.msra.mxu2 %v2050_v10 }
   0xd   :  { %356 = vmatpush.bf16.msra.mxu3 %v2058_v11 }
   0xe   :  { %315 = vmatpush.bf16.msra.mxu0 %v2033_v12 }
   0xf   :  { %329 = vmatpush.bf16.msra.mxu1 %v2041_v13 }
  0x10   :  { %343 = vmatpush.bf16.msra.mxu2 %v2049_v14 }
  0x11   :  { %357 = vmatpush.bf16.msra.mxu3 %v2057_v15 }
  0x12   :  { %10 = vsyncpa [#allocation3], 0  ;;  %316 = vmatpush.bf16.msra.mxu0 %v2032_v16  ;;  %v2031_v20 = vld [vmem:[%s2855_s1 + $0x10] sm:$0xff]  ;;  %v2030_v24 = vld [vmem:[%s2855_s1 + $0x8] sm:$0xff]  ;;  %vm392_vm0 = vcmask 261120   ;;  %s2189_s8 = smov 116  }
  0x13   :  { %330 = vmatpush.bf16.msra.mxu1 %v2040_v17  ;;  %v2039_v21 = vld [vmem:[%s2855_s1 + $0x50] sm:$0xff]  ;;  %v2038_v25 = vld [vmem:[%s2855_s1 + $0x48] sm:$0xff]  ;;  %v2029_v28 = vld [vmem:[%s2855_s1] sm:$0xff]  ;;  %vm502_vm1 = vcmask 1045504   ;;  %s2190_s22 = smov 96   ;;  %vm474_vm2 = vcmask 97280  }
  0x14   :  { %344 = vmatpush.bf16.msra.mxu2 %v2048_v18  ;;  %v2047_v22 = vld [vmem:[%s2855_s1 + $0x90] sm:$0xff]  ;;  %v2046_v26 = vld [vmem:[%s2855_s1 + $0x88] sm:$0xff]  ;;  %v2037_v29 = vld [vmem:[%s2855_s1 + $0x40] sm:$0xff]  ;;  %s2191_s21 = smov [#allocation2]   ;;  %s1715_s25 = sshll.u32 %s2859_s5, 4  ;;  %s1716_s25 = int_to_ptr.hbm [resolvable:$true] %s1715_s25 }
  0x15   :  { %358 = vmatpush.bf16.msra.mxu3 %v2056_v19  ;;  %v2055_v23 = vld [vmem:[%s2855_s1 + $0xd0] sm:$0xff]  ;;  %v2054_v27 = vld [vmem:[%s2855_s1 + $0xc8] sm:$0xff]  ;;  %v2045_v30 = vld [vmem:[%s2855_s1 + $0x80] sm:$0xff]  ;;  %s1713_s23 = sshll.u32 %s2191_s21, 4  ;;  %s1714_s23 = int_to_ptr.vmem [resolvable:$true] %s1713_s23 }
  0x16   :  { %317 = vmatpush.bf16.msra.mxu0 %v2031_v20  ;;  %v2053_v31 = vld [vmem:[%s2855_s1 + $0xc0] sm:$0xff]  ;;  %v45_v34 = vld [vmem:[%s2854_s0 + $0x8] sm:$0xff]  ;;  %v46_v36 = vld [vmem:[%s2854_s0 + $0x10] sm:$0xff] }
  0x17   :  { %331 = vmatpush.bf16.msra.mxu1 %v2039_v21  ;;  %v44_v32 = vld [vmem:[%s2854_s0] sm:$0xff]  ;;  %v49_v35 = vld [vmem:[%s2854_s0 + $0x28] sm:$0xf]  ;;  %v50_v37 = vld [vmem:[%s2854_s0 + $0x30] sm:$0xf] }
  0x18   :  { %345 = vmatpush.bf16.msra.mxu2 %v2047_v22  ;;  %v48_v33 = vld [vmem:[%s2854_s0 + $0x20] sm:$0xf]  ;;  %v47_v38 = vld [vmem:[%s2854_s0 + $0x18] sm:$0xff]  ;;  %v53_v41 = vpack.c.bf16 %v49_v35, %v45_v34  ;;  %v54_v42 = vpack.c.bf16 %v50_v37, %v46_v36  ;;  %v2062_v44 = vld [vmem:[%s2857_s3 + $0x8] sm:$0xff] }
  0x19   :  { %359 = vmatpush.bf16.msra.mxu3 %v2055_v23  ;;  %v51_v39 = vld [vmem:[%s2854_s0 + $0x38] sm:$0xf]  ;;  %v52_v40 = vpack.c.bf16 %v48_v33, %v44_v32  ;;  %v2061_v45 = vld [vmem:[%s2857_s3] sm:$0xff]  ;;  %v1867_v61 = vld [vmem:[%s2856_s2 + $0x10] sm:$0xf] }
  0x1a   :  { %318 = vmatpush.bf16.msra.mxu0 %v2030_v24  ;;  %v55_v43 = vpack.c.bf16 %v51_v39, %v47_v38  ;;  %v2019_v62 = vld [vmem:[%s2856_s2 + $0x14] sm:$0xf0]  ;;  %v1875_v0 = vld [vmem:[%s2856_s2 + $0x30] sm:$0xf]  ;;  %v1871_v3 = vld [vmem:[%s2856_s2 + $0x20] sm:$0xf] }
  0x1b   :  { %332 = vmatpush.bf16.msra.mxu1 %v2038_v25  ;;  %v2361_v63 = vor.u32 %v2019_v62, %v1867_v61  ;;  %v2021_v1 = vld [vmem:[%s2856_s2 + $0x34] sm:$0xf0]  ;;  %v2020_v4 = vld [vmem:[%s2856_s2 + $0x24] sm:$0xf0]  ;;  %v1879_v6 = vld [vmem:[%s2856_s2 + $0x40] sm:$0xf] }
  0x1c   :  { %346 = vmatpush.bf16.msra.mxu2 %v2046_v26  ;;  %v2369_v2 = vor.u32 %v2021_v1, %v1875_v0  ;;  %v2381_v5 = vor.u32 %v2020_v4, %v1871_v3  ;;  %v2022_v7 = vld [vmem:[%s2856_s2 + $0x44] sm:$0xf0]  ;;  %v1887_v10 = vld [vmem:[%s2856_s2 + $0x60] sm:$0xf]  ;;  %v1883_v22 = vld [vmem:[%s2856_s2 + $0x50] sm:$0xf] }
  0x1d   :  { %360 = vmatpush.bf16.msra.mxu3 %v2054_v27  ;;  %458 = vrot.lane.b32.xlu1 %v2361_v63, %s2189_s8  ;;  %v2389_v8 = vor.u32 %v2022_v7, %v1879_v6  ;;  %v2024_v11 = vld [vmem:[%s2856_s2 + $0x64] sm:$0xf0]  ;;  %v2074_v13 = vld [vmem:[%s2858_s4] ss:$0 sm:$0xff]  ;;  %v2023_v23 = vld [vmem:[%s2856_s2 + $0x54] sm:$0xf0] }
  0x1e   :  { %319 = vmatpush.bf16.msra.mxu0 %v2029_v28  ;;  %462 = vrot.lane.b32.xlu2 %v2369_v2, %s2189_s8  ;;  %v2401_v12 = vor.u32 %v2024_v11, %v1887_v10  ;;  %v1863_v19 = vld [vmem:[%s2856_s2] sm:$0xf]  ;;  %v2018_v20 = vld [vmem:[%s2856_s2 + $0x4] sm:$0xf0]  ;;  %v2426_v24 = vor.u32 %v2023_v23, %v1883_v22  ;;  %v1891_v28 = vld [vmem:[%s2856_s2 + $0x70] sm:$0xf] }
  0x1f   :  { %333 = vmatpush.bf16.msra.mxu1 %v2037_v29  ;;  %v2416_v21 = vor.u32 %v2018_v20, %v1863_v19  ;;  %v1895_v25 = vld [vmem:[%s2856_s2 + $0x80] sm:$0xf]  ;;  %v2026_v26 = vld [vmem:[%s2856_s2 + $0x84] sm:$0xf0]  ;;  %v2025_v29 = vld [vmem:[%s2856_s2 + $0x74] sm:$0xf0] }
  0x20   :  { %347 = vmatpush.bf16.msra.mxu2 %v2045_v30  ;;  %v2436_v27 = vor.u32 %v2026_v26, %v1895_v25  ;;  %v2446_v30 = vor.u32 %v2025_v29, %v1891_v28 }
  0x21   :  { %361 = vmatpush.bf16.msra.mxu3 %v2053_v31  ;;  %320 = vmatmul.bf16.vlgmr.msra.gmra.mxu0 %v52_v40  ;;  %v2064_v40 = vld [vmem:[%s2857_s3 + $0x28] sm:$0xff] }
  0x22   :  { %334 = vmatmul.bf16.vlgmr.msra.gmra.mxu1 %v53_v41  ;;  %402 = vmatpush.bf16.msrb.mxu0 %v2062_v44  ;;  %2865 = vst [vmem:[#allocation7_spill] sm:$0xff] %v2436_v27  ;;  %v2063_v41 = vld [vmem:[%s2857_s3 + $0x20] sm:$0xff] }
  0x23   :  { %348 = vmatmul.bf16.vlgmr.msra.gmra.mxu2 %v54_v42 }
  0x24   :  { %362 = vmatmul.bf16.vlgmr.msra.gmra.mxu3 %v55_v43 }
  0x25   :  { %460 = vrot.lane.b32.xlu1 %v2381_v5, %s2189_s8  ;;  %755 = vmatpush.bf16.msrb.mxu3 %v2064_v40 }
  0x26   :  { %403 = vmatpush.bf16.msrb.mxu0 %v2061_v45  ;;  %464 = vrot.lane.b32.xlu2 %v2389_v8, %s2189_s8 }
  0x29   :  { %756 = vmatpush.bf16.msrb.mxu3 %v2063_v41 }
  0x2d   :  { %468 = vrot.lane.b32.xlu1 %v2401_v12, %s2189_s8 }
  0x2e   :  { %470 = vrot.lane.b32.xlu2 %v2446_v30, %s2189_s8 }
  0x78   :  { %v2471_v36 = vpop.permute.xlu2 %462 }
  0x80   :  { %v2477_v37 = vpop.permute.xlu2 %464 }
  0x88   :  { %v2501_v42 = vpop.permute.xlu2 %470 }
  0x8f   :  { %v2459_v34 = vpop.permute.xlu1 %458 }
  0x97   :  { %v2465_v35 = vpop.permute.xlu1 %460 }
  0x9e   :  { %v321_v46 = vpop.f32.mrf.mxu0 }
  0x9f   :  { %v335_v47 = vpop.f32.mrf.mxu1  ;;  %v2489_v39 = vpop.permute.xlu1 %468 }
  0xa0   :  { %v336_v50 = vadd.f32 %v335_v47, %v321_v46 }
  0xa6   :  { %v349_v48 = vpop.f32.mrf.mxu2  ;;  %v323_v51 = vpop.f32.mrf.mxu0 }
  0xa7   :  { %v363_v49 = vpop.f32.mrf.mxu3  ;;  %v337_v52 = vpop.f32.mrf.mxu1  ;;  %v350_v53 = vadd.f32 %v349_v48, %v336_v50 }
  0xa8   :  { %v338_v54 = vadd.f32 %v337_v52, %v323_v51 }
  0xa9   :  { %v2348_v58 = vadd.f32 %v363_v49, %v350_v53 }
  0xab   :  { %2863 = vst [vmem:[#allocation5_spill] sm:$0xff] %v2348_v58 }
  0xae   :  { %v351_v55 = vpop.f32.mrf.mxu2 }
  0xaf   :  { %v352_v56 = vadd.f32 %v351_v55, %v338_v54  ;;  %v365_v57 = vpop.f32.mrf.mxu3 }
  0xb1   :  { %v2350_v59 = vadd.f32 %v365_v57, %v352_v56 }
  0xb3   :  { %2864 = vst [vmem:[#allocation6_spill] sm:$0xff] %v2350_v59  ;;  %v378_v60 = vpack.c.bf16 %v2350_v59, %v2348_v58 }
  0xb5   :  { %1860 = vmatmul.msk.bf16.vlgmr.msrb.gmra.mxu0 %vm392_vm0, %v378_v60 }
 0x132   :  { %v405_v9 = vpop.f32.mrf.mxu0 }
 0x133   :  { %v406_v15 = vadd.f32 %v2074_v13, %v405_v9 }
 0x13a   :  { %v407_v14 = vpop.f32.mrf.mxu0 }
 0x13b   :  { %v408_v16 = vadd.f32 %v2074_v13, %v407_v14 }
 0x13d   :  { %v410_v17 = vpack.c.bf16 %v408_v16, %v406_v15 }
 0x13f   :  { %561 = vrot.lane.b32.xlu0 %v410_v17, %s2190_s22  ;;  %v504_v18 = vsel %vm502_vm1, %v410_v17, 0 }
 0x140   :  { %513 = vmatpush.bf16.msrb.mxu1 %v504_v18 }
 0x147   :  { %456 = vrot.lane.b32.xlu0 %v2416_v21, %s2189_s8 }
 0x14f   :  { %466 = vrot.lane.b32.xlu0 %v2426_v24, %s2189_s8 }
 0x157   :  { %472 = vrot.lane.b32.xlu0 %v2436_v27, %s2189_s8 }
 0x1b1   :  { %v562_v31 = vpop.permute.xlu0 %561 }
 0x1b2   :  { %v591_v32 = vsel %vm502_vm1, %v562_v31, 0 }
 0x1b3   :  { %600 = vmatpush.bf16.msrb.mxu2 %v591_v32 }
 0x1b6   :  { %1906 = vmatmul.msk.bf16.vlgmr.msrb.gmra.mxu2 %vm474_vm2, %v2416_v21 }
 0x1b9   :  { %v2453_v33 = vpop.permute.xlu0 %456 }
 0x1ba   :  { %1897 = vmatmul.msk.bf16.vlgmr.msrb.gmra.mxu1 %vm474_vm2, %v2453_v33 }
 0x1c1   :  { %v2483_v38 = vpop.permute.xlu0 %466 }
 0x1c6   :  { %1907 = vmatmul.msk.bf16.gmra.mxu2 %vm474_vm2, %v2361_v63 }
 0x1c9   :  { %v2509_v44 = vpop.permute.xlu0 %472 }
 0x1ca   :  { %1898 = vmatmul.msk.bf16.gmra.mxu1 %vm474_vm2, %v2459_v34 }
 0x1d6   :  { %1908 = vmatmul.msk.bf16.gmra.mxu2 %vm474_vm2, %v2381_v5 }
 0x1da   :  { %1899 = vmatmul.msk.bf16.gmra.mxu1 %vm474_vm2, %v2465_v35 }
 0x1e6   :  { %1909 = vmatmul.msk.bf16.gmra.mxu2 %vm474_vm2, %v2369_v2 }
 0x1ea   :  { %1900 = vmatmul.msk.bf16.gmra.mxu1 %vm474_vm2, %v2471_v36 }
 0x1f6   :  { %1910 = vmatmul.msk.bf16.gmra.mxu2 %vm474_vm2, %v2389_v8 }
 0x1fa   :  { %1901 = vmatmul.msk.bf16.gmra.mxu1 %vm474_vm2, %v2477_v37 }
 0x206   :  { %1911 = vmatmul.msk.bf16.gmra.mxu2 %vm474_vm2, %v2426_v24 }
 0x20a   :  { %1902 = vmatmul.msk.bf16.gmra.mxu1 %vm474_vm2, %v2483_v38 }
 0x216   :  { %1912 = vmatmul.msk.bf16.gmra.mxu2 %vm474_vm2, %v2401_v12 }
 0x21a   :  { %1903 = vmatmul.msk.bf16.gmra.mxu1 %vm474_vm2, %v2489_v39 }
 0x226   :  { %1913 = vmatmul.msk.bf16.gmra.mxu2 %vm474_vm2, %v2446_v30 }
 0x22a   :  { %1904 = vmatmul.msk.bf16.gmra.mxu1 %vm474_vm2, %v2501_v42 }
 0x236   :  { %1914 = vmatmul.msk.bf16.gmra.mxu2 %vm474_vm2, %v2436_v27 }
 0x237   :  { %v2507_v43 = vpop.f32.mrf.mxu1 }
 0x239   :  { %v602_v45 = vpop.f32.mrf.mxu2 }
 0x23a   :  { %1905 = vmatmul.msk.bf16.gmra.mxu1 %vm474_vm2, %v2509_v44  ;;  %v603_v46 = vadd.f32 %v602_v45, %v2507_v43 }
 0x23c   :  { %v665_v49 = vmul.f32 0.2, %v603_v46  ;;  %vm647_vm3 = vcmp.gt.f32.partialorder %v603_v46, 0.0 }
 0x23e   :  { %v683_v52 = vsel %vm647_vm3, %v603_v46, %v665_v49 }
 0x23f   :  { %v2514_v47 = vpop.f32.mrf.mxu1 }
 0x241   :  { %v604_v48 = vpop.f32.mrf.mxu2 }
 0x242   :  { %v605_v50 = vadd.f32 %v604_v48, %v2514_v47 }
 0x244   :  { %vm648_vm4 = vcmp.gt.f32.partialorder %v605_v50, 0.0  ;;  %v666_v51 = vmul.f32 0.2, %v605_v50 }
 0x246   :  { %v684_v53 = vsel %vm648_vm4, %v605_v50, %v666_v51 }
 0x247   :  { %v701_v54 = vpack.c.bf16 %v684_v53, %v683_v52  ;;  %v2517_v55 = vpop.f32.mrf.mxu1 }
 0x249   :  { %v607_v56 = vpop.f32.mrf.mxu2  ;;  %1923 = vmatmul.msk.bf16.vlgmr.msrb.gmra.mxu3 %vm392_vm0, %v701_v54 }
 0x24a   :  { %v608_v57 = vadd.f32 %v607_v56, %v2517_v55 }
 0x24c   :  { %v667_v62 = vmul.f32 0.2, %v608_v57  ;;  %vm649_vm5 = vcmp.gt.f32.partialorder %v608_v57, 0.0 }
 0x24e   :  { %v685_v3 = vsel %vm649_vm5, %v608_v57, %v667_v62 }
 0x24f   :  { %v2521_v60 = vpop.f32.mrf.mxu1 }
 0x251   :  { %v609_v61 = vpop.f32.mrf.mxu2 }
 0x252   :  { %v610_v0 = vadd.f32 %v609_v61, %v2521_v60 }
 0x254   :  { %vm650_vm6 = vcmp.gt.f32.partialorder %v610_v0, 0.0  ;;  %v668_v1 = vmul.f32 0.2, %v610_v0 }
 0x256   :  { %v686_v4 = vsel %vm650_vm6, %v610_v0, %v668_v1  ;;  %vm876_vm6 = vcmask 1041408  }
 0x257   :  { %v2524_v6 = vpop.f32.mrf.mxu1  ;;  %v702_v7 = vpack.c.bf16 %v686_v4, %v685_v3 }
 0x259   :  { %v612_v9 = vpop.f32.mrf.mxu2  ;;  %1924 = vmatmul.msk.bf16.gmra.mxu3 %vm392_vm0, %v702_v7 }
 0x25a   :  { %v613_v10 = vadd.f32 %v612_v9, %v2524_v6 }
 0x25c   :  { %v669_v14 = vmul.f32 0.2, %v613_v10  ;;  %vm651_vm7 = vcmp.gt.f32.partialorder %v613_v10, 0.0 }
 0x25e   :  { %v687_v17 = vsel %vm651_vm7, %v613_v10, %v669_v14 }
 0x25f   :  { %v2528_v11 = vpop.f32.mrf.mxu1 }
 0x261   :  { %v614_v13 = vpop.f32.mrf.mxu2 }
 0x262   :  { %v615_v15 = vadd.f32 %v614_v13, %v2528_v11 }
 0x264   :  { %vm652_vm8 = vcmp.gt.f32.partialorder %v615_v15, 0.0  ;;  %v670_v16 = vmul.f32 0.2, %v615_v15 }
 0x266   :  { %v688_v18 = vsel %vm652_vm8, %v615_v15, %v670_v16 }
 0x267   :  { %v2531_v19 = vpop.f32.mrf.mxu1  ;;  %v703_v20 = vpack.c.bf16 %v688_v18, %v687_v17 }
 0x269   :  { %v617_v22 = vpop.f32.mrf.mxu2  ;;  %1925 = vmatmul.msk.bf16.gmra.mxu3 %vm392_vm0, %v703_v20 }
 0x26a   :  { %v618_v23 = vadd.f32 %v617_v22, %v2531_v19 }
 0x26c   :  { %v671_v28 = vmul.f32 0.2, %v618_v23  ;;  %vm653_vm9 = vcmp.gt.f32.partialorder %v618_v23, 0.0 }
 0x26e   :  { %v689_v32 = vsel %vm653_vm9, %v618_v23, %v671_v28  ;;  %vm848_vm9 = vcmask 31744  }
 0x26f   :  { %v2535_v25 = vpop.f32.mrf.mxu1 }
 0x271   :  { %v619_v26 = vpop.f32.mrf.mxu2 }
 0x272   :  { %v620_v29 = vadd.f32 %v619_v26, %v2535_v25 }
 0x274   :  { %vm654_vm10 = vcmp.gt.f32.partialorder %v620_v29, 0.0  ;;  %v672_v31 = vmul.f32 0.2, %v620_v29 }
 0x276   :  { %v690_v40 = vsel %vm654_vm10, %v620_v29, %v672_v31  ;;  %vm970_vm10 = vcmask 130048  }
 0x277   :  { %v2538_v41 = vpop.f32.mrf.mxu1  ;;  %v704_v45 = vpack.c.bf16 %v690_v40, %v689_v32 }
 0x279   :  { %v622_v46 = vpop.f32.mrf.mxu2  ;;  %1926 = vmatmul.msk.bf16.gmra.mxu3 %vm392_vm0, %v704_v45 }
 0x27a   :  { %v623_v48 = vadd.f32 %v622_v46, %v2538_v41 }
 0x27c   :  { %v673_v51 = vmul.f32 0.2, %v623_v48  ;;  %vm655_vm11 = vcmp.gt.f32.partialorder %v623_v48, 0.0 }
 0x27e   :  { %v691_v54 = vsel %vm655_vm11, %v623_v48, %v673_v51 }
 0x27f   :  { %v2542_v49 = vpop.f32.mrf.mxu1 }
 0x281   :  { %v624_v50 = vpop.f32.mrf.mxu2 }
 0x282   :  { %v625_v52 = vadd.f32 %v624_v50, %v2542_v49 }
 0x284   :  { %vm656_vm12 = vcmp.gt.f32.partialorder %v625_v52, 0.0  ;;  %v674_v53 = vmul.f32 0.2, %v625_v52 }
 0x286   :  { %v692_v56 = vsel %vm656_vm12, %v625_v52, %v674_v53 }
 0x287   :  { %v2545_v57 = vpop.f32.mrf.mxu1  ;;  %v705_v61 = vpack.c.bf16 %v692_v56, %v691_v54 }
 0x289   :  { %v627_v62 = vpop.f32.mrf.mxu2  ;;  %1927 = vmatmul.msk.bf16.gmra.mxu3 %vm392_vm0, %v705_v61 }
 0x28a   :  { %v628_v0 = vadd.f32 %v627_v62, %v2545_v57 }
 0x28c   :  { %v675_v4 = vmul.f32 0.2, %v628_v0  ;;  %vm657_vm13 = vcmp.gt.f32.partialorder %v628_v0, 0.0 }
 0x28e   :  { %v693_v10 = vsel %vm657_vm13, %v628_v0, %v675_v4  ;;  %v42_v0 = vld [vmem:[%s2856_s2 + $0xa0] sm:$0x3] }
 0x28f   :  { %v2549_v1 = vpop.f32.mrf.mxu1  ;;  %v2573_v4 = vsel %vm876_vm6, %v42_v0, 0 }
 0x290   :  { %887 = vmatpush.bf16.msra.mxu0 %v2573_v4 }
 0x291   :  { %v629_v3 = vpop.f32.mrf.mxu2 }
 0x292   :  { %v630_v7 = vadd.f32 %v629_v3, %v2549_v1 }
 0x294   :  { %vm658_vm14 = vcmp.gt.f32.partialorder %v630_v7, 0.0  ;;  %v676_v9 = vmul.f32 0.2, %v630_v7 }
 0x296   :  { %v694_v13 = vsel %vm658_vm14, %v630_v7, %v676_v9 }
 0x297   :  { %v2552_v14 = vpop.f32.mrf.mxu1  ;;  %v706_v15 = vpack.c.bf16 %v694_v13, %v693_v10 }
 0x299   :  { %v632_v16 = vpop.f32.mrf.mxu2  ;;  %1928 = vmatmul.msk.bf16.gmra.mxu3 %vm392_vm0, %v706_v15 }
 0x29a   :  { %v633_v17 = vadd.f32 %v632_v16, %v2552_v14 }
 0x29c   :  { %v677_v22 = vmul.f32 0.2, %v633_v17  ;;  %vm659_vm15 = vcmp.gt.f32.partialorder %v633_v17, 0.0 }
 0x29e   :  { %v695_v28 = vsel %vm659_vm15, %v633_v17, %v677_v22 }
 0x29f   :  { %v2556_v18 = vpop.f32.mrf.mxu1 }
 0x2a1   :  { %v634_v20 = vpop.f32.mrf.mxu2 }
 0x2a2   :  { %v635_v23 = vadd.f32 %v634_v20, %v2556_v18 }
 0x2a4   :  { %vm660_vm3 = vcmp.gt.f32.partialorder %v635_v23, 0.0  ;;  %v678_v26 = vmul.f32 0.2, %v635_v23 }
 0x2a6   :  { %v696_v29 = vsel %vm660_vm3, %v635_v23, %v678_v26 }
 0x2a7   :  { %v2559_v31 = vpop.f32.mrf.mxu1  ;;  %v707_v32 = vpack.c.bf16 %v696_v29, %v695_v28 }
 0x2a9   :  { %v637_v40 = vpop.f32.mrf.mxu2  ;;  %1929 = vmatmul.msk.bf16.gmra.mxu3 %vm392_vm0, %v707_v32 }
 0x2aa   :  { %v638_v45 = vadd.f32 %v637_v40, %v2559_v31 }
 0x2ac   :  { %v679_v50 = vmul.f32 0.2, %v638_v45  ;;  %vm661_vm4 = vcmp.gt.f32.partialorder %v638_v45, 0.0 }
 0x2ae   :  { %v697_v53 = vsel %vm661_vm4, %v638_v45, %v679_v50 }
 0x2af   :  { %v2563_v46 = vpop.f32.mrf.mxu1 }
 0x2b1   :  { %v639_v48 = vpop.f32.mrf.mxu2 }
 0x2b2   :  { %v640_v51 = vadd.f32 %v639_v48, %v2563_v46 }
 0x2b4   :  { %vm662_vm5 = vcmp.gt.f32.partialorder %v640_v51, 0.0  ;;  %v680_v52 = vmul.f32 0.2, %v640_v51 }
 0x2b6   :  { %v698_v54 = vsel %vm662_vm5, %v640_v51, %v680_v52 }
 0x2b7   :  { %v2566_v56 = vpop.f32.mrf.mxu1  ;;  %v708_v61 = vpack.c.bf16 %v698_v54, %v697_v53 }
 0x2b9   :  { %v642_v62 = vpop.f32.mrf.mxu2  ;;  %1930 = vmatmul.msk.bf16.gmra.mxu3 %vm392_vm0, %v708_v61 }
 0x2ba   :  { %v643_v3 = vadd.f32 %v642_v62, %v2566_v56 }
 0x2bc   :  { %v681_v9 = vmul.f32 0.2, %v643_v3  ;;  %vm663_vm7 = vcmp.gt.f32.partialorder %v643_v3, 0.0 }
 0x2be   :  { %v699_v16 = vsel %vm663_vm7, %v643_v3, %v681_v9 }
 0x2bf   :  { %v2576_v7 = vpop.f32.mrf.mxu1 }
 0x2c1   :  { %v644_v10 = vpop.f32.mrf.mxu2 }
 0x2c2   :  { %v645_v13 = vadd.f32 %v644_v10, %v2576_v7 }
 0x2c4   :  { %vm664_vm8 = vcmp.gt.f32.partialorder %v645_v13, 0.0  ;;  %v682_v15 = vmul.f32 0.2, %v645_v13 }
 0x2c6   :  { %v700_v17 = vsel %vm664_vm8, %v645_v13, %v682_v15 }
 0x2c7   :  { %v709_v20 = vpack.c.bf16 %v700_v17, %v699_v16 }
 0x2c9   :  { %1931 = vmatmul.msk.bf16.gmra.mxu3 %vm392_vm0, %v709_v20 }
 0x2cc   :  { %v758_v22 = vpop.f32.mrf.mxu3 }
 0x2cd   :  { %v803_v23 = vmul.f32 1.442695, %v758_v22 }
 0x2cf   :  { %2079 = vpow2.f32 %v803_v23 }
 0x2d4   :  { %v760_v26 = vpop.f32.mrf.mxu3 }
 0x2d5   :  { %v805_v28 = vmul.f32 1.442695, %v760_v26  ;;  %v2080_v29 = vpop.eup %2079 }
 0x2d7   :  { %2081 = vpow2.f32 %v805_v28 }
 0x2dc   :  { %v763_v32 = vpop.f32.mrf.mxu3 }
 0x2dd   :  { %v2082_v40 = vpop.eup %2081  ;;  %v807_v48 = vmul.f32 1.442695, %v763_v32 }
 0x2de   :  { %v839_v45 = vpack.c.bf16 %v2082_v40, %v2080_v29 }
 0x2df   :  { %2083 = vpow2.f32 %v807_v48 }
 0x2e0   :  { %1932 = vmatmul.msk.bf16.vlgmr.msra.gmra.mxu0 %vm848_vm9, %v839_v45 }
 0x2e4   :  { %v765_v50 = vpop.f32.mrf.mxu3 }
 0x2e5   :  { %v809_v51 = vmul.f32 1.442695, %v765_v50  ;;  %v2084_v52 = vpop.eup %2083 }
 0x2e7   :  { %2085 = vpow2.f32 %v809_v51 }
 0x2ec   :  { %v768_v53 = vpop.f32.mrf.mxu3 }
 0x2ed   :  { %v2086_v54 = vpop.eup %2085  ;;  %v811_v62 = vmul.f32 1.442695, %v768_v53 }
 0x2ee   :  { %v840_v61 = vpack.c.bf16 %v2086_v54, %v2084_v52 }
 0x2ef   :  { %2087 = vpow2.f32 %v811_v62 }
 0x2f0   :  { %1933 = vmatmul.msk.bf16.gmra.mxu0 %vm848_vm9, %v840_v61 }
 0x2f4   :  { %v770_v0 = vpop.f32.mrf.mxu3 }
 0x2f5   :  { %v813_v3 = vmul.f32 1.442695, %v770_v0  ;;  %v2088_v9 = vpop.eup %2087 }
 0x2f7   :  { %2089 = vpow2.f32 %v813_v3 }
 0x2fc   :  { %v773_v10 = vpop.f32.mrf.mxu3 }
 0x2fd   :  { %v2090_v13 = vpop.eup %2089  ;;  %v815_v16 = vmul.f32 1.442695, %v773_v10 }
 0x2fe   :  { %v841_v15 = vpack.c.bf16 %v2090_v13, %v2088_v9 }
 0x2ff   :  { %2091 = vpow2.f32 %v815_v16 }
 0x300   :  { %1934 = vmatmul.msk.bf16.gmra.mxu0 %vm848_vm9, %v841_v15 }
 0x304   :  { %v775_v17 = vpop.f32.mrf.mxu3 }
 0x305   :  { %v817_v20 = vmul.f32 1.442695, %v775_v17  ;;  %v2092_v22 = vpop.eup %2091 }
 0x307   :  { %2093 = vpow2.f32 %v817_v20 }
 0x30c   :  { %v778_v23 = vpop.f32.mrf.mxu3 }
 0x30d   :  { %v2094_v26 = vpop.eup %2093  ;;  %v819_v29 = vmul.f32 1.442695, %v778_v23 }
 0x30e   :  { %v842_v28 = vpack.c.bf16 %v2094_v26, %v2092_v22 }
 0x30f   :  { %2095 = vpow2.f32 %v819_v29 }
 0x310   :  { %1935 = vmatmul.msk.bf16.gmra.mxu0 %vm848_vm9, %v842_v28 }
 0x314   :  { %v780_v32 = vpop.f32.mrf.mxu3 }
 0x315   :  { %v821_v40 = vmul.f32 1.442695, %v780_v32  ;;  %v2096_v45 = vpop.eup %2095 }
 0x317   :  { %2097 = vpow2.f32 %v821_v40 }
 0x31c   :  { %v783_v48 = vpop.f32.mrf.mxu3 }
 0x31d   :  { %v2098_v50 = vpop.eup %2097  ;;  %v823_v52 = vmul.f32 1.442695, %v783_v48 }
 0x31e   :  { %v843_v51 = vpack.c.bf16 %v2098_v50, %v2096_v45 }
 0x31f   :  { %2099 = vpow2.f32 %v823_v52 }
 0x320   :  { %1936 = vmatmul.msk.bf16.gmra.mxu0 %vm848_vm9, %v843_v51 }
 0x324   :  { %v785_v53 = vpop.f32.mrf.mxu3 }
 0x325   :  { %v825_v54 = vmul.f32 1.442695, %v785_v53  ;;  %v2100_v61 = vpop.eup %2099 }
 0x327   :  { %2101 = vpow2.f32 %v825_v54 }
 0x32c   :  { %v788_v62 = vpop.f32.mrf.mxu3 }
 0x32d   :  { %v2102_v0 = vpop.eup %2101  ;;  %v827_v9 = vmul.f32 1.442695, %v788_v62 }
 0x32e   :  { %v844_v3 = vpack.c.bf16 %v2102_v0, %v2100_v61 }
 0x32f   :  { %2103 = vpow2.f32 %v827_v9 }
 0x330   :  { %1937 = vmatmul.msk.bf16.gmra.mxu0 %vm848_vm9, %v844_v3 }
 0x334   :  { %v790_v10 = vpop.f32.mrf.mxu3 }
 0x335   :  { %v829_v13 = vmul.f32 1.442695, %v790_v10  ;;  %v2104_v15 = vpop.eup %2103 }
 0x337   :  { %2105 = vpow2.f32 %v829_v13 }
 0x33c   :  { %v793_v16 = vpop.f32.mrf.mxu3 }
 0x33d   :  { %v2106_v17 = vpop.eup %2105  ;;  %v831_v22 = vmul.f32 1.442695, %v793_v16 }
 0x33e   :  { %v845_v20 = vpack.c.bf16 %v2106_v17, %v2104_v15 }
 0x33f   :  { %2107 = vpow2.f32 %v831_v22 }
 0x340   :  { %1938 = vmatmul.msk.bf16.gmra.mxu0 %vm848_vm9, %v845_v20 }
 0x344   :  { %v795_v23 = vpop.f32.mrf.mxu3 }
 0x345   :  { %v833_v26 = vmul.f32 1.442695, %v795_v23  ;;  %v2108_v28 = vpop.eup %2107 }
 0x347   :  { %2109 = vpow2.f32 %v833_v26 }
 0x34c   :  { %v798_v29 = vpop.f32.mrf.mxu3 }
 0x34d   :  { %v2110_v32 = vpop.eup %2109  ;;  %v835_v45 = vmul.f32 1.442695, %v798_v29 }
 0x34e   :  { %v846_v40 = vpack.c.bf16 %v2110_v32, %v2108_v28 }
 0x34f   :  { %2111 = vpow2.f32 %v835_v45 }
 0x350   :  { %1939 = vmatmul.msk.bf16.gmra.mxu0 %vm848_vm9, %v846_v40 }
 0x354   :  { %v800_v48 = vpop.f32.mrf.mxu3 }
 0x355   :  { %v837_v50 = vmul.f32 1.442695, %v800_v48  ;;  %v2112_v51 = vpop.eup %2111 }
 0x357   :  { %2113 = vpow2.f32 %v837_v50 }
 0x35d   :  { %v2114_v52 = vpop.eup %2113  ;;  %v2588_v53 = vpop.f32.mrf.mxu0 }
 0x35e   :  { %v847_v54 = vpack.c.bf16 %v2114_v52, %v2112_v51 }
 0x360   :  { %1940 = vmatmul.msk.bf16.gmra.mxu0 %vm848_vm9, %v847_v54 }
 0x365   :  { %v2591_v61 = vpop.f32.mrf.mxu0 }
 0x36d   :  { %v2593_v62 = vpop.f32.mrf.mxu0 }
 0x375   :  { %v2595_v0 = vpop.f32.mrf.mxu0 }
 0x37d   :  { %v899_v3 = vpop.f32.mrf.mxu0 }
 0x385   :  { %v901_v9 = vpop.f32.mrf.mxu0 }
 0x38d   :  { %v904_v10 = vpop.f32.mrf.mxu0 }
 0x395   :  { %v906_v13 = vpop.f32.mrf.mxu0 }
 0x39d   :  { %v909_v15 = vpop.f32.mrf.mxu0 }
 0x3a5   :  { %v911_v16 = vpop.f32.mrf.mxu0 }
 0x3ad   :  { %v914_v17 = vpop.f32.mrf.mxu0 }
 0x3ae   :  { %v944_v58 = vmul.f32 %v914_v17, %v2545_v57  ;;  %v1945_v57 = vld [vmem:[%s2856_s2 + $0x98] sm:$0x30] }
 0x3b5   :  { %v916_v20 = vpop.f32.mrf.mxu0 }
 0x3b6   :  { %v945_v52 = vmul.f32 %v916_v20, %v2549_v1  ;;  %v1007_v27 = vpack.c.bf16 %v916_v20, %v914_v17  ;;  %v2027_v1 = vld [vmem:[%s2856_s2 + $0x94] sm:$0xf]  ;;  %v939_v17 = vmul.f32 %v901_v9, %v2528_v11  ;;  %v936_v11 = vmul.f32 %v2593_v62, %v2517_v55 }
 0x3b7   :  { %v934_v55 = vmul.f32 %v2588_v53, %v2507_v43  ;;  %v2066_v43 = vld [vmem:[%s2857_s3 + $0x18] sm:$0xff] }
 0x3bd   :  { %v919_v22 = vpop.f32.mrf.mxu0 }
 0x3be   :  { %v946_v50 = vmul.f32 %v919_v22, %v2552_v14  ;;  %v941_v14 = vmul.f32 %v906_v13, %v2535_v25  ;;  %v2615_v25 = vor.u32 %v2027_v1, %v1945_v57 }
 0x3c5   :  { %v921_v23 = vpop.f32.mrf.mxu0 }
 0x3c6   :  { %v947_v45 = vmul.f32 %v921_v23, %v2556_v18  ;;  %v1008_v51 = vpack.c.bf16 %v921_v23, %v919_v22  ;;  %v942_v18 = vmul.f32 %v909_v15, %v2538_v41 }
 0x3c8   :  { %v958_v54 = vpack.c.bf16 %v947_v45, %v946_v50  ;;  %v2065_v45 = vld [vmem:[%s2857_s3 + $0x10] sm:$0xff] }
 0x3cd   :  { %v924_v26 = vpop.f32.mrf.mxu0 }
 0x3ce   :  { %v948_v29 = vmul.f32 %v924_v26, %v2559_v31  ;;  %v943_v31 = vmul.f32 %v911_v16, %v2542_v49  ;;  %v940_v49 = vmul.f32 %v904_v10, %v2531_v19  ;;  %v1004_v19 = vpack.c.bf16 %v901_v9, %v899_v3  ;;  %v2028_v9 = vld [vmem:[%s2856_s2 + $0x94] sm:$0x30] }
 0x3d0   :  { %v956_v22 = vpack.c.bf16 %v943_v31, %v942_v18  ;;  %v955_v23 = vpack.c.bf16 %v941_v14, %v940_v49  ;;  %v2075_v49 = vld [vmem:[%s2858_s4 + $0x2] ss:$0 sm:$0xff] }
 0x3d5   :  { %v926_v28 = vpop.f32.mrf.mxu0 }
 0x3d6   :  { %v949_v32 = vmul.f32 %v926_v28, %v2563_v46  ;;  %v1009_v40 = vpack.c.bf16 %v926_v28, %v924_v26  ;;  %v957_v46 = vpack.c.bf16 %v945_v52, %v944_v58  ;;  %v1006_v26 = vpack.c.bf16 %v911_v16, %v909_v15 }
 0x3d7   :  { %v1005_v58 = vpack.c.bf16 %v906_v13, %v904_v10  ;;  %v938_v28 = vmul.f32 %v899_v3, %v2524_v6  ;;  %v1003_v6 = vpack.c.bf16 %v2595_v0, %v2593_v62  ;;  %v1002_v62 = vpack.c.bf16 %v2591_v61, %v2588_v53 }
 0x3d8   :  { %v959_v48 = vpack.c.bf16 %v949_v32, %v948_v29  ;;  %1011 = vmatpush.bf16.msra.mxu3 %v1009_v40 }
 0x3da   :  { %974 = vmatpush.bf16.msra.mxu1 %v959_v48 }
 0x3dc   :  { %1012 = vmatpush.bf16.msra.mxu3 %v1008_v51 }
 0x3dd   :  { %v929_v59 = vpop.f32.mrf.mxu0 }
 0x3de   :  { %975 = vmatpush.bf16.msra.mxu1 %v958_v54  ;;  %v950_v41 = vmul.f32 %v929_v59, %v2566_v56  ;;  %v954_v56 = vpack.c.bf16 %v939_v17, %v938_v28 }
 0x3e0   :  { %1013 = vmatpush.bf16.msra.mxu3 %v1007_v27 }
 0x3e2   :  { %976 = vmatpush.bf16.msra.mxu1 %v957_v46 }
 0x3e4   :  { %1014 = vmatpush.bf16.msra.mxu3 %v1006_v26 }
 0x3e5   :  { %v931_v27 = vpop.f32.mrf.mxu0 }
 0x3e6   :  { %v951_v15 = vmul.f32 %v931_v27, %v2576_v7  ;;  %v1010_v16 = vpack.c.bf16 %v931_v27, %v929_v59  ;;  %977 = vmatpush.bf16.msra.mxu1 %v956_v22  ;;  %v937_v59 = vmul.f32 %v2595_v0, %v2521_v60  ;;  %v935_v7 = vmul.f32 %v2591_v61, %v2514_v47  ;;  %v1943_v60 = vld [vmem:[%s2856_s2 + $0x90] sm:$0xf] }
 0x3e7   :  { %v2641_v0 = vor.u32 %v2028_v9, %v1943_v60 }
 0x3e8   :  { %v960_v20 = vpack.c.bf16 %v951_v15, %v950_v41  ;;  %1015 = vmatpush.bf16.msra.mxu3 %v1005_v58  ;;  %1032 = vmatpush.bf16.msrb.mxu0 %v1010_v16  ;;  %v953_v3 = vpack.c.bf16 %v937_v59, %v936_v11  ;;  %v952_v47 = vpack.c.bf16 %v935_v7, %v934_v55 }
 0x3ea   :  { %978 = vmatpush.bf16.msra.mxu1 %v955_v23  ;;  %995 = vmatpush.bf16.msra.mxu2 %v960_v20 }
 0x3eb   :  { %1950 = vmatmul.msk.bf16.vlgmr.msrb.gmra.mxu0 %vm970_vm10, %v2615_v25 }
 0x3ec   :  { %1016 = vmatpush.bf16.msra.mxu3 %v1004_v19 }
 0x3ed   :  { %1949 = vmatmul.msk.bf16.vlgmr.msra.gmra.mxu2 %vm970_vm10, %v2615_v25 }
 0x3ee   :  { %979 = vmatpush.bf16.msra.mxu1 %v954_v56 }
 0x3f0   :  { %1017 = vmatpush.bf16.msra.mxu3 %v1003_v6 }
 0x3f2   :  { %980 = vmatpush.bf16.msra.mxu1 %v953_v3 }
 0x3f4   :  { %1018 = vmatpush.bf16.msra.mxu3 %v1002_v62 }
 0x3f6   :  { %981 = vmatpush.bf16.msra.mxu1 %v952_v47 }
 0x3f7   :  { %1019 = vmatmul.bf16.vlgmr.msra.gmra.mxu3 %v2641_v0 }
 0x3f9   :  { %982 = vmatmul.bf16.vlgmr.msra.gmra.mxu1 %v2641_v0 }
 0x3fa   :  { %1115 = vmatpush.bf16.msrb.mxu1 %v2066_v43 }
 0x3fe   :  { %1116 = vmatpush.bf16.msrb.mxu1 %v2065_v45 }
 0x402   :  { %1476 = vmatpush.bf16.msra.mxu1 %v2573_v4 }
 0x468   :  { %v1034_v10 = vpop.f32.mrf.mxu0 }
 0x470   :  { %v1036_v53 = vpop.f32.mrf.mxu0  ;;  %v997_v52 = vpop.f32.mrf.mxu2 }
 0x476   :  { %v983_v51 = vpop.f32.mrf.mxu1 }
 0x477   :  { %v998_v18 = vadd.f32 %v997_v52, %v983_v51 }
 0x478   :  { %v999_v23 = vpop.f32.mrf.mxu2 }
 0x47a   :  { %v1020_v13 = vpop.f32.mrf.mxu3 }
 0x47b   :  { %v1035_v29 = vadd.f32 %v1034_v10, %v1020_v13 }
 0x47d   :  { %2115 = vrcp.f32 %v1035_v29  ;;  %v1050_v54 = vand.u32 2147483648, %v1035_v29  ;;  %v1048_v46 = vand.u32 2147483647, %v1035_v29  ;;  %vm1044_vm12 = vweird.f32 %v1035_v29 }
 0x47e   :  { %v985_v20 = vpop.f32.mrf.mxu1 }
 0x47f   :  { %v1051_v22 = vor.u32 1.1754944e-38, %v1050_v54  ;;  %vm1049_vm14 = vcmp.eq.f32.partialorder %v1048_v46, 8.507059e+37  ;;  %v1000_v56 = vadd.f32 %v999_v23, %v985_v20 }
 0x482   :  { %v1022_v61 = vpop.f32.mrf.mxu3 }
 0x483   :  { %v2116_v32 = vpop.eup %2115  ;;  %v1037_v40 = vadd.f32 %v1036_v53, %v1022_v61  ;;  %v2076_v53 = vld [vmem:[%s2858_s4 + $0x1] ss:$0 sm:$0xff] }
 0x484   :  { %v1040_v48 = vmul.f32 %v2116_v32, %v1035_v29  ;;  %vm1045_vm11 = vweird.f32 %v2116_v32 }
 0x485   :  { %2117 = vrcp.f32 %v1037_v40  ;;  %vm1046_vm13 = vmor %vm1044_vm12, %vm1045_vm11  ;;  %v1065_v41 = vand.u32 2147483648, %v1037_v40  ;;  %v1063_v17 = vand.u32 2147483647, %v1037_v40  ;;  %vm1059_vm3 = vweird.f32 %v1037_v40 }
 0x486   :  { %v1041_v50 = vsub.f32 1.0, %v1040_v48 }
 0x487   :  { %v1066_v19 = vor.u32 1.1754944e-38, %v1065_v41  ;;  %vm1064_vm5 = vcmp.eq.f32.partialorder %v1063_v17, 8.507059e+37 }
 0x488   :  { %v1042_v31 = vmul.f32 %v2116_v32, %v1041_v50 }
 0x48a   :  { %v1043_v26 = vadd.f32 %v2116_v32, %v1042_v31 }
 0x48b   :  { %v2118_v14 = vpop.eup %2117 }
 0x48c   :  { %v1055_v1 = vmul.f32 %v2118_v14, %v1037_v40  ;;  %v1047_v57 = vsel %vm1046_vm13, %v2116_v32, %v1043_v26  ;;  %vm1060_vm15 = vweird.f32 %v2118_v14 }
 0x48d   :  { %v1052_v4 = vsel %vm1049_vm14, %v1051_v22, %v1047_v57  ;;  %vm1061_vm4 = vmor %vm1059_vm3, %vm1060_vm15 }
 0x48e   :  { %v1056_v27 = vsub.f32 1.0, %v1055_v1  ;;  %v1053_v58 = vmul.f32 %v1052_v4, %v998_v18 }
 0x490   :  { %v1070_v15 = vadd.f32 %v2075_v49, %v1053_v58  ;;  %v1057_v16 = vmul.f32 %v2118_v14, %v1056_v27 }
 0x492   :  { %v1058_v28 = vadd.f32 %v2118_v14, %v1057_v16  ;;  %v1074_v59 = vmul.f32 1.442695, %v1070_v15  ;;  %vm1072_vm6 = vcmp.gt.f32.partialorder %v1070_v15, 0.0 }
 0x494   :  { %v1062_v11 = vsel %vm1061_vm4, %v2118_v14, %v1058_v28  ;;  %2119 = vpow2.f32 %v1074_v59 }
 0x495   :  { %v1067_v6 = vsel %vm1064_vm5, %v1066_v19, %v1062_v11 }
 0x496   :  { %v1068_v7 = vmul.f32 %v1067_v6, %v1000_v56 }
 0x498   :  { %v1071_v3 = vadd.f32 %v2075_v49, %v1068_v7 }
 0x49a   :  { %v1076_v60 = vmul.f32 1.442695, %v1071_v3  ;;  %v2120_v9 = vpop.eup %2119  ;;  %vm1073_vm7 = vcmp.gt.f32.partialorder %v1071_v3, 0.0 }
 0x49b   :  { %v1951_v55 = vadd.f32 -1.0, %v2120_v9 }
 0x49c   :  { %2121 = vpow2.f32 %v1076_v60 }
 0x49d   :  { %v1080_v10 = vsel %vm1072_vm6, %v1070_v15, %v1951_v55 }
 0x4a2   :  { %v2122_v62 = vpop.eup %2121 }
 0x4a3   :  { %v1952_v47 = vadd.f32 -1.0, %v2122_v62 }
 0x4a5   :  { %v1081_v13 = vsel %vm1073_vm7, %v1071_v3, %v1952_v47 }
 0x4a6   :  { %v1092_v29 = vpack.c.bf16 %v1081_v13, %v1080_v10 }
 0x4a8   :  { %1961 = vmatmul.msk.bf16.vlgmr.msrb.gmra.mxu1 %vm392_vm0, %v1092_v29 }
 0x525   :  { %v1118_v43 = vpop.f32.mrf.mxu1 }
 0x526   :  { %v1119_v32 = vadd.f32 %v2076_v53, %v1118_v43 }
 0x52d   :  { %v1120_v61 = vpop.f32.mrf.mxu1 }
 0x52e   :  { %v1121_v40 = vadd.f32 %v2076_v53, %v1120_v61 }
 0x530   :  { %v1123_v45 = vpack.c.bf16 %v1121_v40, %v1119_v32 }
 0x532   :  { %1182 = vrot.lane.b32.xlu1 %v1123_v45, %s2190_s22  ;;  %v1125_v48 = vsel %vm502_vm1, %v1123_v45, 0 }
 0x533   :  { %1134 = vmatpush.bf16.msrb.mxu2 %v1125_v48 }
 0x536   :  { %1962 = vmatmul.msk.bf16.vlgmr.msrb.gmra.mxu2 %vm474_vm2, %v2453_v33 }
 0x546   :  { %1963 = vmatmul.msk.bf16.gmra.mxu2 %vm474_vm2, %v2459_v34 }
 0x556   :  { %1964 = vmatmul.msk.bf16.gmra.mxu2 %vm474_vm2, %v2465_v35 }
 0x566   :  { %1965 = vmatmul.msk.bf16.gmra.mxu2 %vm474_vm2, %v2471_v36 }
 0x576   :  { %1966 = vmatmul.msk.bf16.gmra.mxu2 %vm474_vm2, %v2477_v37 }
 0x586   :  { %1967 = vmatmul.msk.bf16.gmra.mxu2 %vm474_vm2, %v2483_v38 }
 0x596   :  { %1968 = vmatmul.msk.bf16.gmra.mxu2 %vm474_vm2, %v2489_v39 }
 0x5a4   :  { %v1183_v50 = vpop.permute.xlu1 %1182 }
 0x5a5   :  { %v1185_v33 = vsel %vm502_vm1, %v1183_v50, 0 }
 0x5a6   :  { %1969 = vmatmul.msk.bf16.gmra.mxu2 %vm474_vm2, %v2501_v42  ;;  %1194 = vmatpush.bf16.msrb.mxu3 %v1185_v33 }
 0x5a9   :  { %1971 = vmatmul.msk.bf16.vlgmr.msrb.gmra.mxu3 %vm474_vm2, %v2416_v21 }
 0x5b6   :  { %1970 = vmatmul.msk.bf16.gmra.mxu2 %vm474_vm2, %v2509_v44 }
 0x5b9   :  { %1972 = vmatmul.msk.bf16.gmra.mxu3 %vm474_vm2, %v2361_v63  ;;  %v2694_v21 = vpop.f32.mrf.mxu2  ;;  %v2068_v63 = vld [vmem:[%s2857_s3 + $0x38] sm:$0xff] }
 0x5ba   :  { %1349 = vmatpush.bf16.msra.mxu0 %v2068_v63 }
 0x5c1   :  { %v2699_v34 = vpop.f32.mrf.mxu2 }
 0x5c9   :  { %1973 = vmatmul.msk.bf16.gmra.mxu3 %vm474_vm2, %v2381_v5  ;;  %v2706_v5 = vpop.f32.mrf.mxu2 }
 0x5d9   :  { %1974 = vmatmul.msk.bf16.gmra.mxu3 %vm474_vm2, %v2369_v2  ;;  %v2067_v2 = vld [vmem:[%s2857_s3 + $0x30] sm:$0xff] }
 0x5da   :  { %1350 = vmatpush.bf16.msra.mxu0 %v2067_v2 }
 0x5e9   :  { %1975 = vmatmul.msk.bf16.gmra.mxu3 %vm474_vm2, %v2389_v8  ;;  %v2708_v8 = vpop.f32.mrf.mxu2 }
 0x5f1   :  { %v2713_v36 = vpop.f32.mrf.mxu2 }
 0x5f9   :  { %1976 = vmatmul.msk.bf16.gmra.mxu3 %vm474_vm2, %v2426_v24  ;;  %v2716_v52 = vpop.f32.mrf.mxu2 }
 0x601   :  { %v2721_v14 = vpop.f32.mrf.mxu2 }
 0x609   :  { %1977 = vmatmul.msk.bf16.gmra.mxu3 %vm474_vm2, %v2401_v12  ;;  %v2866_v12 = vld [vmem:[#allocation7_spill] sm:$0xff]  ;;  %v2724_v27 = vpop.f32.mrf.mxu2 }
 0x611   :  { %v2728_v28 = vpop.f32.mrf.mxu2 }
 0x619   :  { %1978 = vmatmul.msk.bf16.gmra.mxu3 %vm474_vm2, %v2446_v30  ;;  %v2732_v11 = vpop.f32.mrf.mxu2 }
 0x621   :  { %v2736_v10 = vpop.f32.mrf.mxu2 }
 0x629   :  { %1979 = vmatmul.msk.bf16.gmra.mxu3 %vm474_vm2, %v2866_v12  ;;  %v2740_v32 = vpop.f32.mrf.mxu2 }
 0x62c   :  { %v1196_v24 = vpop.f32.mrf.mxu3 }
 0x62d   :  { %v1197_v35 = vadd.f32 %v1196_v24, %v2694_v21 }
 0x62f   :  { %v1259_v38 = vmul.f32 0.2, %v1197_v35  ;;  %vm1241_vm8 = vcmp.gt.f32.partialorder %v1197_v35, 0.0 }
 0x631   :  { %v1277_v42 = vsel %vm1241_vm8, %v1197_v35, %v1259_v38  ;;  %v2744_v63 = vpop.f32.mrf.mxu2 }
 0x634   :  { %v1198_v37 = vpop.f32.mrf.mxu3 }
 0x635   :  { %v1199_v39 = vadd.f32 %v1198_v37, %v2699_v34 }
 0x637   :  { %vm1242_vm11 = vcmp.gt.f32.partialorder %v1199_v39, 0.0  ;;  %v1260_v30 = vmul.f32 0.2, %v1199_v39 }
 0x639   :  { %v1278_v44 = vsel %vm1242_vm11, %v1199_v39, %v1260_v30  ;;  %v2747_v30 = vpop.f32.mrf.mxu2 }
 0x63a   :  { %v1295_v51 = vpack.c.bf16 %v1278_v44, %v1277_v42 }
 0x63c   :  { %v1201_v54 = vpop.f32.mrf.mxu3  ;;  %1988 = vmatmul.msk.bf16.vlgmr.msra.gmra.mxu0 %vm392_vm0, %v1295_v51 }
 0x63d   :  { %v1202_v31 = vadd.f32 %v1201_v54, %v2706_v5 }
 0x63f   :  { %v1261_v18 = vmul.f32 0.2, %v1202_v31  ;;  %vm1243_vm12 = vcmp.gt.f32.partialorder %v1202_v31, 0.0 }
 0x641   :  { %v1279_v1 = vsel %vm1243_vm12, %v1202_v31, %v1261_v18 }
 0x644   :  { %v1203_v46 = vpop.f32.mrf.mxu3 }
 0x645   :  { %v1204_v26 = vadd.f32 %v1203_v46, %v2708_v8  ;;  %v2752_v46 = vpop.f32.mrf.mxu2 }
 0x647   :  { %vm1244_vm13 = vcmp.gt.f32.partialorder %v1204_v26, 0.0  ;;  %v1262_v22 = vmul.f32 0.2, %v1204_v26 }
 0x649   :  { %v1280_v57 = vsel %vm1244_vm13, %v1204_v26, %v1262_v22 }
 0x64a   :  { %v1296_v49 = vpack.c.bf16 %v1280_v57, %v1279_v1 }
 0x64c   :  { %v1206_v4 = vpop.f32.mrf.mxu3  ;;  %1989 = vmatmul.msk.bf16.gmra.mxu0 %vm392_vm0, %v1296_v49 }
 0x64d   :  { %v1207_v58 = vadd.f32 %v1206_v4, %v2713_v36  ;;  %v2755_v49 = vpop.f32.mrf.mxu2 }
 0x64f   :  { %v1263_v15 = vmul.f32 0.2, %v1207_v58  ;;  %vm1245_vm14 = vcmp.gt.f32.partialorder %v1207_v58, 0.0 }
 0x651   :  { %v1281_v20 = vsel %vm1245_vm14, %v1207_v58, %v1263_v15 }
 0x654   :  { %v1208_v41 = vpop.f32.mrf.mxu3 }
 0x655   :  { %v1209_v16 = vadd.f32 %v1208_v41, %v2716_v52 }
 0x657   :  { %vm1246_vm15 = vcmp.gt.f32.partialorder %v1209_v16, 0.0  ;;  %v1264_v17 = vmul.f32 0.2, %v1209_v16 }
 0x659   :  { %v1282_v23 = vsel %vm1246_vm15, %v1209_v16, %v1264_v17 }
 0x65a   :  { %v1297_v19 = vpack.c.bf16 %v1282_v23, %v1281_v20  ;;  %v2759_v23 = vpop.f32.mrf.mxu2 }
 0x65c   :  { %v1211_v59 = vpop.f32.mrf.mxu3  ;;  %1990 = vmatmul.msk.bf16.gmra.mxu0 %vm392_vm0, %v1297_v19 }
 0x65d   :  { %v1212_v56 = vadd.f32 %v1211_v59, %v2721_v14 }
 0x65f   :  { %v1265_v7 = vmul.f32 0.2, %v1212_v56  ;;  %vm1247_vm3 = vcmp.gt.f32.partialorder %v1212_v56, 0.0 }
 0x661   :  { %v1283_v9 = vsel %vm1247_vm3, %v1212_v56, %v1265_v7 }
 0x664   :  { %v1213_v6 = vpop.f32.mrf.mxu3 }
 0x665   :  { %v1214_v3 = vadd.f32 %v1213_v6, %v2724_v27  ;;  %v2763_v6 = vpop.f32.mrf.mxu2 }
 0x667   :  { %vm1248_vm4 = vcmp.gt.f32.partialorder %v1214_v3, 0.0  ;;  %v1266_v60 = vmul.f32 0.2, %v1214_v3 }
 0x669   :  { %v1284_v55 = vsel %vm1248_vm4, %v1214_v3, %v1266_v60 }
 0x66a   :  { %v1298_v62 = vpack.c.bf16 %v1284_v55, %v1283_v9 }
 0x66c   :  { %v1216_v47 = vpop.f32.mrf.mxu3  ;;  %1991 = vmatmul.msk.bf16.gmra.mxu0 %vm392_vm0, %v1298_v62 }
 0x66d   :  { %v1217_v13 = vadd.f32 %v1216_v47, %v2728_v28 }
 0x66f   :  { %v1267_v43 = vmul.f32 0.2, %v1217_v13  ;;  %vm1249_vm5 = vcmp.gt.f32.partialorder %v1217_v13, 0.0 }
 0x671   :  { %v1285_v40 = vsel %vm1249_vm5, %v1217_v13, %v1267_v43 }
 0x674   :  { %v1218_v29 = vpop.f32.mrf.mxu3 }
 0x675   :  { %v1219_v53 = vadd.f32 %v1218_v29, %v2732_v11 }
 0x677   :  { %vm1250_vm6 = vcmp.gt.f32.partialorder %v1219_v53, 0.0  ;;  %v1268_v61 = vmul.f32 0.2, %v1219_v53 }
 0x679   :  { %v1286_v45 = vsel %vm1250_vm6, %v1219_v53, %v1268_v61 }
 0x67a   :  { %v1299_v48 = vpack.c.bf16 %v1286_v45, %v1285_v40 }
 0x67c   :  { %v1221_v50 = vpop.f32.mrf.mxu3  ;;  %1992 = vmatmul.msk.bf16.gmra.mxu0 %vm392_vm0, %v1299_v48 }
 0x67d   :  { %v1222_v33 = vadd.f32 %v1221_v50, %v2736_v10 }
 0x67f   :  { %v1269_v12 = vmul.f32 0.2, %v1222_v33  ;;  %vm1251_vm7 = vcmp.gt.f32.partialorder %v1222_v33, 0.0 }
 0x681   :  { %v1287_v37 = vsel %vm1251_vm7, %v1222_v33, %v1269_v12 }
 0x684   :  { %v1223_v2 = vpop.f32.mrf.mxu3 }
 0x685   :  { %v1224_v24 = vadd.f32 %v1223_v2, %v2740_v32 }
 0x687   :  { %vm1252_vm8 = vcmp.gt.f32.partialorder %v1224_v24, 0.0  ;;  %v1270_v35 = vmul.f32 0.2, %v1224_v24 }
 0x689   :  { %v1288_v38 = vsel %vm1252_vm8, %v1224_v24, %v1270_v35 }
 0x68a   :  { %v1300_v39 = vpack.c.bf16 %v1288_v38, %v1287_v37 }
 0x68c   :  { %v1226_v42 = vpop.f32.mrf.mxu3  ;;  %1993 = vmatmul.msk.bf16.gmra.mxu0 %vm392_vm0, %v1300_v39 }
 0x68d   :  { %v1227_v44 = vadd.f32 %v1226_v42, %v2744_v63 }
 0x68f   :  { %v1271_v54 = vmul.f32 0.2, %v1227_v44  ;;  %vm1253_vm11 = vcmp.gt.f32.partialorder %v1227_v44, 0.0 }
 0x691   :  { %v1289_v26 = vsel %vm1253_vm11, %v1227_v44, %v1271_v54 }
 0x694   :  { %v1228_v51 = vpop.f32.mrf.mxu3 }
 0x695   :  { %v1229_v31 = vadd.f32 %v1228_v51, %v2747_v30 }
 0x697   :  { %vm1254_vm12 = vcmp.gt.f32.partialorder %v1229_v31, 0.0  ;;  %v1272_v18 = vmul.f32 0.2, %v1229_v31 }
 0x699   :  { %v1290_v22 = vsel %vm1254_vm12, %v1229_v31, %v1272_v18 }
 0x69a   :  { %v1301_v1 = vpack.c.bf16 %v1290_v22, %v1289_v26 }
 0x69c   :  { %v1231_v57 = vpop.f32.mrf.mxu3  ;;  %1994 = vmatmul.msk.bf16.gmra.mxu0 %vm392_vm0, %v1301_v1 }
 0x69d   :  { %v1232_v4 = vadd.f32 %v1231_v57, %v2752_v46 }
 0x69f   :  { %v1273_v41 = vmul.f32 0.2, %v1232_v4  ;;  %vm1255_vm13 = vcmp.gt.f32.partialorder %v1232_v4, 0.0 }
 0x6a1   :  { %v1291_v17 = vsel %vm1255_vm13, %v1232_v4, %v1273_v41 }
 0x6a4   :  { %v1233_v58 = vpop.f32.mrf.mxu3 }
 0x6a5   :  { %v1234_v15 = vadd.f32 %v1233_v58, %v2755_v49 }
 0x6a7   :  { %vm1256_vm14 = vcmp.gt.f32.partialorder %v1234_v15, 0.0  ;;  %v1274_v16 = vmul.f32 0.2, %v1234_v15 }
 0x6a9   :  { %v1292_v20 = vsel %vm1256_vm14, %v1234_v15, %v1274_v16 }
 0x6aa   :  { %v1302_v19 = vpack.c.bf16 %v1292_v20, %v1291_v17 }
 0x6ac   :  { %v1236_v59 = vpop.f32.mrf.mxu3  ;;  %1995 = vmatmul.msk.bf16.gmra.mxu0 %vm392_vm0, %v1302_v19 }
 0x6ad   :  { %v1237_v56 = vadd.f32 %v1236_v59, %v2759_v23 }
 0x6af   :  { %v1275_v3 = vmul.f32 0.2, %v1237_v56  ;;  %vm1257_vm15 = vcmp.gt.f32.partialorder %v1237_v56, 0.0 }
 0x6b1   :  { %v1293_v55 = vsel %vm1257_vm15, %v1237_v56, %v1275_v3 }
 0x6b4   :  { %v1238_v7 = vpop.f32.mrf.mxu3 }
 0x6b5   :  { %v1239_v60 = vadd.f32 %v1238_v7, %v2763_v6 }
 0x6b7   :  { %vm1258_vm3 = vcmp.gt.f32.partialorder %v1239_v60, 0.0  ;;  %v1276_v9 = vmul.f32 0.2, %v1239_v60 }
 0x6b9   :  { %v1294_v62 = vsel %vm1258_vm3, %v1239_v60, %v1276_v9  ;;  %v1352_v47 = vpop.f32.mrf.mxu0 }
 0x6ba   :  { %v1303_v13 = vpack.c.bf16 %v1294_v62, %v1293_v55  ;;  %v1397_v29 = vmul.f32 1.442695, %v1352_v47 }
 0x6bc   :  { %1996 = vmatmul.msk.bf16.gmra.mxu0 %vm392_vm0, %v1303_v13  ;;  %2123 = vpow2.f32 %v1397_v29 }
 0x6c1   :  { %v1354_v43 = vpop.f32.mrf.mxu0 }
 0x6c2   :  { %v1399_v53 = vmul.f32 1.442695, %v1354_v43  ;;  %v2124_v61 = vpop.eup %2123 }
 0x6c4   :  { %2125 = vpow2.f32 %v1399_v53 }
 0x6c9   :  { %v1357_v40 = vpop.f32.mrf.mxu0 }
 0x6ca   :  { %v2126_v45 = vpop.eup %2125  ;;  %v1401_v50 = vmul.f32 1.442695, %v1357_v40 }
 0x6cb   :  { %v1433_v48 = vpack.c.bf16 %v2126_v45, %v2124_v61 }
 0x6cc   :  { %2127 = vpow2.f32 %v1401_v50 }
 0x6cd   :  { %1997 = vmatmul.msk.bf16.vlgmr.msra.gmra.mxu1 %vm848_vm9, %v1433_v48 }
 0x6d1   :  { %v1359_v33 = vpop.f32.mrf.mxu0 }
 0x6d2   :  { %v1403_v2 = vmul.f32 1.442695, %v1359_v33  ;;  %v2128_v12 = vpop.eup %2127 }
 0x6d4   :  { %2129 = vpow2.f32 %v1403_v2 }
 0x6d9   :  { %v1362_v24 = vpop.f32.mrf.mxu0 }
 0x6da   :  { %v2130_v35 = vpop.eup %2129  ;;  %v1405_v38 = vmul.f32 1.442695, %v1362_v24 }
 0x6db   :  { %v1434_v37 = vpack.c.bf16 %v2130_v35, %v2128_v12 }
 0x6dc   :  { %2131 = vpow2.f32 %v1405_v38 }
 0x6dd   :  { %1998 = vmatmul.msk.bf16.gmra.mxu1 %vm848_vm9, %v1434_v37 }
 0x6e1   :  { %v1364_v39 = vpop.f32.mrf.mxu0 }
 0x6e2   :  { %v1407_v42 = vmul.f32 1.442695, %v1364_v39  ;;  %v2132_v44 = vpop.eup %2131 }
 0x6e4   :  { %2133 = vpow2.f32 %v1407_v42 }
 0x6e9   :  { %v1367_v51 = vpop.f32.mrf.mxu0 }
 0x6ea   :  { %v2134_v54 = vpop.eup %2133  ;;  %v1409_v18 = vmul.f32 1.442695, %v1367_v51 }
 0x6eb   :  { %v1435_v31 = vpack.c.bf16 %v2134_v54, %v2132_v44 }
 0x6ec   :  { %2135 = vpow2.f32 %v1409_v18 }
 0x6ed   :  { %1999 = vmatmul.msk.bf16.gmra.mxu1 %vm848_vm9, %v1435_v31 }
 0x6f1   :  { %v1369_v26 = vpop.f32.mrf.mxu0 }
 0x6f2   :  { %v1411_v22 = vmul.f32 1.442695, %v1369_v26  ;;  %v2136_v1 = vpop.eup %2135 }
 0x6f4   :  { %2137 = vpow2.f32 %v1411_v22 }
 0x6f9   :  { %v1372_v57 = vpop.f32.mrf.mxu0 }
 0x6fa   :  { %v2138_v4 = vpop.eup %2137  ;;  %v1413_v41 = vmul.f32 1.442695, %v1372_v57 }
 0x6fb   :  { %v1436_v58 = vpack.c.bf16 %v2138_v4, %v2136_v1 }
 0x6fc   :  { %2139 = vpow2.f32 %v1413_v41 }
 0x6fd   :  { %2000 = vmatmul.msk.bf16.gmra.mxu1 %vm848_vm9, %v1436_v58 }
 0x701   :  { %v1374_v15 = vpop.f32.mrf.mxu0 }
 0x702   :  { %v1415_v16 = vmul.f32 1.442695, %v1374_v15  ;;  %v2140_v17 = vpop.eup %2139 }
 0x704   :  { %2141 = vpow2.f32 %v1415_v16 }
 0x709   :  { %v1377_v20 = vpop.f32.mrf.mxu0 }
 0x70a   :  { %v2142_v19 = vpop.eup %2141  ;;  %v1417_v56 = vmul.f32 1.442695, %v1377_v20 }
 0x70b   :  { %v1437_v59 = vpack.c.bf16 %v2142_v19, %v2140_v17 }
 0x70c   :  { %2143 = vpow2.f32 %v1417_v56 }
 0x70d   :  { %2001 = vmatmul.msk.bf16.gmra.mxu1 %vm848_vm9, %v1437_v59 }
 0x711   :  { %v1379_v7 = vpop.f32.mrf.mxu0 }
 0x712   :  { %v1419_v3 = vmul.f32 1.442695, %v1379_v7  ;;  %v2144_v60 = vpop.eup %2143 }
 0x714   :  { %2145 = vpow2.f32 %v1419_v3 }
 0x719   :  { %v1382_v9 = vpop.f32.mrf.mxu0 }
 0x71a   :  { %v2146_v55 = vpop.eup %2145  ;;  %v1421_v47 = vmul.f32 1.442695, %v1382_v9 }
 0x71b   :  { %v1438_v62 = vpack.c.bf16 %v2146_v55, %v2144_v60 }
 0x71c   :  { %2147 = vpow2.f32 %v1421_v47 }
 0x71d   :  { %2002 = vmatmul.msk.bf16.gmra.mxu1 %vm848_vm9, %v1438_v62 }
 0x721   :  { %v1384_v13 = vpop.f32.mrf.mxu0 }
 0x722   :  { %v1423_v29 = vmul.f32 1.442695, %v1384_v13  ;;  %v2148_v43 = vpop.eup %2147 }
 0x724   :  { %2149 = vpow2.f32 %v1423_v29 }
 0x729   :  { %v1387_v53 = vpop.f32.mrf.mxu0 }
 0x72a   :  { %v2150_v61 = vpop.eup %2149  ;;  %v1425_v45 = vmul.f32 1.442695, %v1387_v53 }
 0x72b   :  { %v1439_v40 = vpack.c.bf16 %v2150_v61, %v2148_v43 }
 0x72c   :  { %2151 = vpow2.f32 %v1425_v45 }
 0x72d   :  { %2003 = vmatmul.msk.bf16.gmra.mxu1 %vm848_vm9, %v1439_v40 }
 0x731   :  { %v1389_v48 = vpop.f32.mrf.mxu0 }
 0x732   :  { %v1427_v50 = vmul.f32 1.442695, %v1389_v48  ;;  %v2152_v33 = vpop.eup %2151 }
 0x734   :  { %2153 = vpow2.f32 %v1427_v50 }
 0x739   :  { %v1392_v2 = vpop.f32.mrf.mxu0 }
 0x73a   :  { %v2154_v12 = vpop.eup %2153  ;;  %v1429_v35 = vmul.f32 1.442695, %v1392_v2 }
 0x73b   :  { %v1440_v24 = vpack.c.bf16 %v2154_v12, %v2152_v33 }
 0x73c   :  { %2155 = vpow2.f32 %v1429_v35 }
 0x73d   :  { %2004 = vmatmul.msk.bf16.gmra.mxu1 %vm848_vm9, %v1440_v24 }
 0x741   :  { %v1394_v37 = vpop.f32.mrf.mxu0 }
 0x742   :  { %v1431_v38 = vmul.f32 1.442695, %v1394_v37  ;;  %v2156_v39 = vpop.eup %2155 }
 0x744   :  { %2157 = vpow2.f32 %v1431_v38  ;;  %v2070_v38 = vld [vmem:[%s2857_s3 + $0x48] sm:$0xff] }
 0x74a   :  { %v2158_v42 = vpop.eup %2157  ;;  %v2775_v44 = vpop.f32.mrf.mxu1 }
 0x74b   :  { %v1441_v51 = vpack.c.bf16 %v2158_v42, %v2156_v39  ;;  %v2782_v31 = vmul.f32 %v2775_v44, %v2694_v21 }
 0x74d   :  { %2005 = vmatmul.msk.bf16.gmra.mxu1 %vm848_vm9, %v1441_v51 }
 0x752   :  { %v2778_v54 = vpop.f32.mrf.mxu1 }
 0x753   :  { %v2786_v18 = vmul.f32 %v2778_v54, %v2699_v34  ;;  %v1578_v26 = vpack.c.bf16 %v2778_v54, %v2775_v44 }
 0x755   :  { %v1541_v22 = vpack.c.bf16 %v2786_v18, %v2782_v31 }
 0x75a   :  { %v2792_v1 = vpop.f32.mrf.mxu1 }
 0x75b   :  { %v2798_v4 = vmul.f32 %v2792_v1, %v2706_v5 }
 0x762   :  { %v2794_v57 = vpop.f32.mrf.mxu1 }
 0x763   :  { %v1526_v21 = vmul.f32 %v2794_v57, %v2708_v8  ;;  %v1579_v34 = vpack.c.bf16 %v2794_v57, %v2792_v1 }
 0x765   :  { %v1542_v58 = vpack.c.bf16 %v1526_v21, %v2798_v4 }
 0x76a   :  { %v1488_v41 = vpop.f32.mrf.mxu1 }
 0x76b   :  { %v1527_v16 = vmul.f32 %v1488_v41, %v2713_v36 }
 0x772   :  { %v1490_v15 = vpop.f32.mrf.mxu1 }
 0x773   :  { %v1528_v17 = vmul.f32 %v1490_v15, %v2716_v52  ;;  %v1580_v20 = vpack.c.bf16 %v1490_v15, %v1488_v41 }
 0x775   :  { %v1543_v19 = vpack.c.bf16 %v1528_v17, %v1527_v16 }
 0x77a   :  { %v1493_v59 = vpop.f32.mrf.mxu1 }
 0x77b   :  { %v1529_v5 = vmul.f32 %v1493_v59, %v2721_v14 }
 0x782   :  { %v1495_v56 = vpop.f32.mrf.mxu1 }
 0x783   :  { %v1530_v7 = vmul.f32 %v1495_v56, %v2724_v27  ;;  %v1581_v8 = vpack.c.bf16 %v1495_v56, %v1493_v59  ;;  %v2077_v56 = vld [vmem:[%s2858_s4 + $0x3] ss:$0 sm:$0xff] }
 0x785   :  { %v1544_v3 = vpack.c.bf16 %v1530_v7, %v1529_v5 }
 0x78a   :  { %v1498_v60 = vpop.f32.mrf.mxu1 }
 0x792   :  { %v1500_v9 = vpop.f32.mrf.mxu1 }
 0x793   :  { %v1582_v12 = vpack.c.bf16 %v1500_v9, %v1498_v60 }
 0x79a   :  { %v1503_v55 = vpop.f32.mrf.mxu1 }
 0x79b   :  { %v1533_v33 = vmul.f32 %v1503_v55, %v2736_v10 }
 0x7a2   :  { %v1505_v62 = vpop.f32.mrf.mxu1 }
 0x7a3   :  { %v1534_v45 = vmul.f32 %v1505_v62, %v2740_v32  ;;  %v1583_v2 = vpack.c.bf16 %v1505_v62, %v1503_v55 }
 0x7aa   :  { %v1508_v47 = vpop.f32.mrf.mxu1 }
 0x7ab   :  { %v1535_v27 = vmul.f32 %v1508_v47, %v2744_v63 }
 0x7b2   :  { %v1510_v13 = vpop.f32.mrf.mxu1 }
 0x7b3   :  { %v1536_v61 = vmul.f32 %v1510_v13, %v2747_v30  ;;  %v1584_v40 = vpack.c.bf16 %v1510_v13, %v1508_v47  ;;  %v1531_v30 = vmul.f32 %v1498_v60, %v2728_v28  ;;  %v2867_v47 = vld [vmem:[#allocation5_spill] sm:$0xff] }
 0x7b5   :  { %v1547_v48 = vpack.c.bf16 %v1536_v61, %v1535_v27  ;;  %v2069_v61 = vld [vmem:[%s2857_s3 + $0x40] sm:$0xff] }
 0x7ba   :  { %v1513_v29 = vpop.f32.mrf.mxu1 }
 0x7bb   :  { %v1537_v52 = vmul.f32 %v1513_v29, %v2752_v46  ;;  %v1532_v46 = vmul.f32 %v1500_v9, %v2732_v11 }
 0x7bd   :  { %v1545_v63 = vpack.c.bf16 %v1532_v46, %v1531_v30 }
 0x7c2   :  { %v1515_v36 = vpop.f32.mrf.mxu1 }
 0x7c3   :  { %v1538_v43 = vmul.f32 %v1515_v36, %v2755_v49  ;;  %v1585_v53 = vpack.c.bf16 %v1515_v36, %v1513_v29  ;;  %v1546_v49 = vpack.c.bf16 %v1534_v45, %v1533_v33  ;;  %v2868_v29 = vld [vmem:[#allocation6_spill] sm:$0xff] }
 0x7c5   :  { %v1548_v14 = vpack.c.bf16 %v1538_v43, %v1537_v52  ;;  %1587 = vmatpush.bf16.msrb.mxu0 %v1585_v53  ;;  %v43_v53 = vld [vmem:[%s2856_s2 + $0xb0] sm:$0x1] }
 0x7c7   :  { %1550 = vmatpush.bf16.msra.mxu2 %v1548_v14 }
 0x7c9   :  { %1588 = vmatpush.bf16.msrb.mxu0 %v1584_v40 }
 0x7ca   :  { %v1518_v50 = vpop.f32.mrf.mxu1 }
 0x7cb   :  { %1551 = vmatpush.bf16.msra.mxu2 %v1547_v48  ;;  %v1539_v32 = vmul.f32 %v1518_v50, %v2759_v23  ;;  %v2078_v48 = vld [vmem:[%s2858_s4 + $0x4] ss:$0 sm:$0xff] }
 0x7cd   :  { %1589 = vmatpush.bf16.msrb.mxu0 %v1583_v2 }
 0x7cf   :  { %1552 = vmatpush.bf16.msra.mxu2 %v1546_v49 }
 0x7d1   :  { %1590 = vmatpush.bf16.msrb.mxu0 %v1582_v12 }
 0x7d2   :  { %v1520_v24 = vpop.f32.mrf.mxu1 }
 0x7d3   :  { %v1540_v35 = vmul.f32 %v1520_v24, %v2763_v6  ;;  %v1586_v37 = vpack.c.bf16 %v1520_v24, %v1518_v50  ;;  %1553 = vmatpush.bf16.msra.mxu2 %v1545_v63 }
 0x7d5   :  { %v1549_v10 = vpack.c.bf16 %v1540_v35, %v1539_v32  ;;  %1591 = vmatpush.bf16.msrb.mxu0 %v1581_v8  ;;  %1608 = vmatpush.bf16.msrb.mxu1 %v1586_v37 }
 0x7d7   :  { %1554 = vmatpush.bf16.msra.mxu2 %v1544_v3  ;;  %1571 = vmatpush.bf16.msra.mxu3 %v1549_v10 }
 0x7d8   :  { %2007 = vmatmul.msk.bf16.vlgmr.msrb.gmra.mxu1 %vm970_vm10, %v2615_v25 }
 0x7d9   :  { %1592 = vmatpush.bf16.msrb.mxu0 %v1580_v20 }
 0x7da   :  { %2006 = vmatmul.msk.bf16.vlgmr.msra.gmra.mxu3 %vm970_vm10, %v2615_v25 }
 0x7db   :  { %1555 = vmatpush.bf16.msra.mxu2 %v1543_v19  ;;  %1699 = vmatpush.bf16.msrb.mxu3 %v2070_v38 }
 0x7dd   :  { %1593 = vmatpush.bf16.msrb.mxu0 %v1579_v34 }
 0x7df   :  { %1556 = vmatpush.bf16.msra.mxu2 %v1542_v58  ;;  %1700 = vmatpush.bf16.msrb.mxu3 %v2069_v61 }
 0x7e1   :  { %1594 = vmatpush.bf16.msrb.mxu0 %v1578_v26 }
 0x7e3   :  { %1557 = vmatpush.bf16.msra.mxu2 %v1541_v22 }
 0x7e4   :  { %1595 = vmatmul.bf16.vlgmr.msrb.gmra.mxu0 %v2641_v0 }
 0x7e6   :  { %1558 = vmatmul.bf16.vlgmr.msra.gmra.mxu2 %v2641_v0 }
 0x855   :  { %v1610_v28 = vpop.f32.mrf.mxu1 }
 0x85d   :  { %v1612_v6 = vpop.f32.mrf.mxu1  ;;  %v1573_v31 = vpop.f32.mrf.mxu3 }
 0x861   :  { %v1596_v11 = vpop.f32.mrf.mxu0 }
 0x862   :  { %v1611_v23 = vadd.f32 %v1610_v28, %v1596_v11 }
 0x864   :  { %2159 = vrcp.f32 %v1611_v23  ;;  %v1626_v0 = vand.u32 2147483648, %v1611_v23  ;;  %vm1620_vm10 = vweird.f32 %v1611_v23  ;;  %v1624_v22 = vand.u32 2147483647, %v1611_v23 }
 0x865   :  { %v1575_v19 = vpop.f32.mrf.mxu3 }
 0x866   :  { %v1627_v21 = vor.u32 1.1754944e-38, %v1626_v0  ;;  %vm1625_vm5 = vcmp.eq.f32.partialorder %v1624_v22, 8.507059e+37 }
 0x869   :  { %v1598_v25 = vpop.f32.mrf.mxu0  ;;  %v1559_v54 = vpop.f32.mrf.mxu2 }
 0x86a   :  { %v2160_v39 = vpop.eup %2159  ;;  %v1613_v42 = vadd.f32 %v1612_v6, %v1598_v25  ;;  %v1574_v58 = vadd.f32 %v1573_v31, %v1559_v54 }
 0x86b   :  { %v1616_v44 = vmul.f32 %v2160_v39, %v1611_v23  ;;  %vm1621_vm9 = vweird.f32 %v2160_v39 }
 0x86c   :  { %2161 = vrcp.f32 %v1613_v42  ;;  %vm1622_vm4 = vmor %vm1620_vm10, %vm1621_vm9  ;;  %v1641_v15 = vand.u32 2147483648, %v1613_v42  ;;  %v1639_v17 = vand.u32 2147483647, %v1613_v42  ;;  %vm1635_vm7 = vweird.f32 %v1613_v42 }
 0x86d   :  { %v1617_v51 = vsub.f32 1.0, %v1616_v44 }
 0x86e   :  { %v1642_v7 = vor.u32 1.1754944e-38, %v1641_v15  ;;  %vm1640_vm11 = vcmp.eq.f32.partialorder %v1639_v17, 8.507059e+37 }
 0x86f   :  { %v1618_v18 = vmul.f32 %v2160_v39, %v1617_v51 }
 0x871   :  { %v1619_v26 = vadd.f32 %v2160_v39, %v1618_v18  ;;  %v1561_v20 = vpop.f32.mrf.mxu2 }
 0x872   :  { %v2162_v1 = vpop.eup %2161  ;;  %v1576_v8 = vadd.f32 %v1575_v19, %v1561_v20 }
 0x873   :  { %v1631_v57 = vmul.f32 %v2162_v1, %v1613_v42  ;;  %v1623_v4 = vsel %vm1622_vm4, %v2160_v39, %v1619_v26  ;;  %vm1636_vm6 = vweird.f32 %v2162_v1 }
 0x874   :  { %v1628_v41 = vsel %vm1625_vm5, %v1627_v21, %v1623_v4  ;;  %vm1637_vm8 = vmor %vm1635_vm7, %vm1636_vm6 }
 0x875   :  { %v1632_v34 = vsub.f32 1.0, %v1631_v57  ;;  %v1629_v59 = vmul.f32 %v1628_v41, %v1574_v58 }
 0x877   :  { %v1633_v16 = vmul.f32 %v2162_v1, %v1632_v34  ;;  %v1646_v9 = vadd.f32 %v2077_v56, %v1629_v59 }
 0x879   :  { %v1634_v5 = vadd.f32 %v2162_v1, %v1633_v16  ;;  %v1648_v13 = vadd.f32 %v1646_v9, %v2867_v47 }
 0x87b   :  { %v1638_v3 = vsel %vm1637_vm8, %v2162_v1, %v1634_v5 }
 0x87c   :  { %v1643_v60 = vsel %vm1640_vm11, %v1642_v7, %v1638_v3 }
 0x87d   :  { %v1644_v55 = vmul.f32 %v1643_v60, %v1576_v8 }
 0x87f   :  { %v1647_v62 = vadd.f32 %v2077_v56, %v1644_v55 }
 0x881   :  { %v1649_v36 = vadd.f32 %v1647_v62, %v2868_v29 }
 0x883   :  { %v1650_v52 = vpack.c.bf16 %v1649_v36, %v1648_v13 }
 0x885   :  { %v1655_v43 = vsel %vm502_vm1, %v1650_v52, 0  ;;  %vm1706_vm1 = vcmask 123904  }
 0x886   :  { %1664 = vmatpush.bf16.msrb.mxu2 %v1655_v43 }
 0x889   :  { %2008 = vmatmul.msk.bf16.vlgmr.msrb.gmra.mxu2 %vm474_vm2, %v43_v53 }
 0x90c   :  { %v1666_v14 = vpop.f32.mrf.mxu2 }
 0x90d   :  { %v1670_v27 = vmul.f32 0.16666667, %v1666_v14 }
 0x90f   :  { %v1676_v40 = vpack.c.bf16 %v1670_v27, %v1670_v27 }
 0x911   :  { %2017 = vmatmul.msk.bf16.vlgmr.msrb.gmra.mxu3 %vm392_vm0, %v1676_v40 }
 0x914   :  { %v1668_v45 = vpop.f32.mrf.mxu2 }
 0x994   :  { %v1702_v50 = vpop.f32.mrf.mxu3 }
 0x995   :  { %v1703_v33 = vadd.f32 %v2078_v48, %v1702_v50 }
 0x997   :  { %1707 = vst.msk [vmem:[#allocation2] sm:$0x3] %vm1706_vm1, %v1703_v33 }
 0x998   :  { %1718 = dma.vmem_to_hbm [thread:$0]  %s1714_s23, 32, %s1716_s25, [#allocation3]  }
 0x99c   :  { %v1704_v2 = vpop.f32.mrf.mxu3 }
 0x99d   :  { %2187 = dma.done.wait [#allocation3], 32  }
 0x99e   :  { %2188 = vsyncadd [#allocation3], 4294967264 }
 0x99f   :  { %1723 = vsyncpa [#allocation3], 1 }

</bundles_post_ra>
